<compile_context>
chip_gen: v6e
topology: v6e:2x2x1
jax: 0.10.0
libtpu: 0.0.40
codegen_flags: <defaults>
</compile_context>

<pallas_src>
import math

import jax
import jax.numpy as jnp
import numpy as np
from jax.experimental import pallas as pl
from jax.experimental.pallas import tpu as pltpu

# ---------------- problem sizes (small, consistent with the module) -----------
B = 2        # batch
T = 8        # decoder seq len
TE = 8       # encoder seq len
H = 32       # num_hiddens (= key_size = query_size = value_size = norm_shape)
NUM_HEADS = 4
DH = H // NUM_HEADS
FFN_H = 64   # ffn_num_hiddens
EPS = 1e-5
NEG = -1000000.0


# ------------------------------- Pallas kernel --------------------------------
def decoder_block_kernel(
    x_ref,      # (B*T, H)      f32   decoder input X
    enc_ref,    # (B*TE, H)     f32   encoder outputs
    ev_ref,     # (B,)          i32   encoder valid lens (SMEM scalars)
    wx_ref,     # (H, 3H+F)     bf16  [Wq1|Wk1|Wv1|W1]
    wa_ref,     # (H, 5H)       bf16  [Wo1|Wq2|Wk2|Wv2|Wo2]
    w2_ref,     # (F, H)        bf16  FFN dense2
    p_ref,      # (8, F)        f32   rows = [b1, b2, g1, be1, g2, be2, g3, be3]
    out_ref,    # (B*T, H)      f32
    ctx_ref,    # (B*T, H)      f32   VMEM scratch: per-head context staging
):
    f32 = jnp.float32
    bf16 = jnp.bfloat16

    X = x_ref[...]                      # (B*T, H)   f32
    ENC = enc_ref[...]                  # (B*TE, H)  f32
    P = p_ref[...]                      # (8, F)     f32
    b1 = P[0:1, :]                      # (1, F)
    b2 = P[1:2, 0:H]
    g1, be1 = P[2:3, 0:H], P[3:4, 0:H]
    g2, be2 = P[4:5, 0:H], P[5:6, 0:H]
    g3, be3 = P[6:7, 0:H], P[7:8, 0:H]
    scale = 1.0 / math.sqrt(DH)

    def layer_norm(v, g, beta):
        mu = jnp.mean(v, axis=-1, keepdims=True)
        d = v - mu
        var = jnp.mean(d * d, axis=-1, keepdims=True)
        return d * jax.lax.rsqrt(var + EPS) * g + beta

    def masked_softmax(s, keep):
        # s: (B, Tq, Tk) f32, keep: bool broadcastable to s (True = keep)
        s = jnp.where(keep, s, NEG)
        s = s - jnp.max(s, axis=-1, keepdims=True)
        e = jnp.exp(s)
        return e / jnp.sum(e, axis=-1, keepdims=True)   # exact division

    def attention(q2d, k2d, v2d, lk, wo, keep):
        # q2d: (B*T, H) f32; k2d/v2d: (B*lk, H) f32; wo: (H, H) bf16.
        # Heads statically unrolled; batch handled by the einsum batch dim.
        # Each head's context is stored at a static lane offset into the VMEM
        # scratch; the output projection is then ONE (B*T,H)@(H,H) dot
        # (avoids the per-head dot+add chain on the MXU FIFO result path).
        for h in range(NUM_HEADS):
            q_h = q2d[:, h * DH:(h + 1) * DH].reshape(B, T, DH).astype(bf16)
            k_h = k2d[:, h * DH:(h + 1) * DH].reshape(B, lk, DH).astype(bf16)
            v_h = v2d[:, h * DH:(h + 1) * DH].reshape(B, lk, DH).astype(bf16)
            s = jnp.einsum("bqd,bkd->bqk", q_h, k_h,
                           preferred_element_type=f32) * scale
            a = masked_softmax(s, keep)
            ctx = jnp.einsum("bqk,bkd->bqd", a.astype(bf16), v_h,
                             preferred_element_type=f32)
            ctx_ref[:, h * DH:(h + 1) * DH] = ctx.reshape(B * T, DH)
        return jnp.dot(ctx_ref[...].astype(bf16), wo, preferred_element_type=f32)

    # ---- fused X matmul: self-attn Q|K|V and FFN dense1 pre-activation ----
    xw = jnp.dot(X.astype(bf16), wx_ref[...], preferred_element_type=f32)  # (B*T, 3H+F)

    # ---- self-attention with causal mask (training-mode dec_valid_lens) ----
    row = jax.lax.broadcasted_iota(jnp.int32, (1, T, T), 1)
    col = jax.lax.broadcasted_iota(jnp.int32, (1, T, T), 2)
    causal = col <= row                                               # (1, T, T)
    X2 = attention(xw[:, 0:H], xw[:, H:2 * H], xw[:, 2 * H:3 * H], T,
                   wa_ref[:, 0:H], causal)
    Y = layer_norm(X2 + X, g1, be1)

    # ---- cross-attention with encoder valid-length mask (from SMEM) ----
    q2 = jnp.dot(Y.astype(bf16), wa_ref[:, H:2 * H],
                 preferred_element_type=f32)                          # (B*T, H)
    kv2 = jnp.dot(ENC.astype(bf16), wa_ref[:, 2 * H:4 * H],
                  preferred_element_type=f32)                         # (B*TE, 2H)
    ecol = jax.lax.broadcasted_iota(jnp.int32, (B, T, TE), 2)
    bsel = jax.lax.broadcasted_iota(jnp.int32, (B, T, TE), 0)
    thresh = jnp.full((B, T, TE), ev_ref[0], jnp.int32)
    for b in range(1, B):                     # B=2 -> exactly one select
        thresh = jnp.where(bsel == b, ev_ref[b], thresh)
    enc_keep = ecol < thresh                                          # (B, T, TE)
    Y2 = attention(q2, kv2[:, 0:H], kv2[:, H:2 * H], TE,
                   wa_ref[:, 4 * H:5 * H], enc_keep)
    Z = layer_norm(Y2 + Y, g2, be2)

    # ---- position-wise FFN (applied to X, exactly as the original module) ----
    h1 = jnp.maximum(xw[:, 3 * H:3 * H + FFN_H] + b1, 0.0)           # (B*T, F)
    ffn = jnp.dot(h1.astype(bf16), w2_ref[...], preferred_element_type=f32) + b2
    out_ref[...] = layer_norm(ffn + Z, g3, be3).astype(out_ref.dtype)


# ------------------------------- packing (run ONCE) ----------------------------
def pack_params(params):
    """Hoisted out of the per-call path: pack weights into lane-dense bf16 slabs."""
    bf16 = jnp.bfloat16
    wx = jnp.concatenate(
        [params["wq1"], params["wk1"], params["wv1"], params["w1"]], axis=1
    ).astype(bf16)                                                    # (H, 3H+F)
    wa = jnp.concatenate(
        [params["wo1"], params["wq2"], params["wk2"], params["wv2"],
         params["wo2"]], axis=1).astype(bf16)                         # (H, 5H)
    w2 = params["w2"].astype(bf16)                                    # (F, H)
    pvec = jnp.zeros((8, FFN_H), jnp.float32)
    pvec = pvec.at[0, :].set(params["b1"][0])
    for i, key in enumerate(["b2", "g1", "be1", "g2", "be2", "g3", "be3"]):
        pvec = pvec.at[i + 1, :H].set(params[key][0])
    return {"wx": wx, "wa": wa, "w2": w2, "pvec": pvec}


# ------------------------------- wrapper ---------------------------------------
@jax.jit
def transformer_decoder_block(x, enc_outputs, enc_valid_lens, packed):
    """x: (B,T,H) f32, enc_outputs: (B,TE,H) f32, enc_valid_lens: (B,) int32."""
    x2d = x.reshape(B * T, H)
    enc2d = enc_outputs.reshape(B * TE, H)

    vmem = pl.BlockSpec(memory_space=pltpu.MemorySpace.VMEM)
    smem = pl.BlockSpec(memory_space=pltpu.MemorySpace.SMEM)

    out2d = pl.pallas_call(
        decoder_block_kernel,
        out_shape=jax.ShapeDtypeStruct((B * T, H), jnp.float32),
        in_specs=[vmem, vmem, smem, vmem, vmem, vmem, vmem],
        out_specs=vmem,
        scratch_shapes=[pltpu.VMEM((B * T, H), jnp.float32)],
    )(x2d, enc2d, enc_valid_lens.astype(jnp.int32),
      packed["wx"], packed["wa"], packed["w2"], packed["pvec"])
    return out2d.reshape(B, T, H)


# --------------------------- pure-JAX reference --------------------------------
def reference(x, enc_outputs, enc_valid_lens, params):
    def layer_norm(v, g, beta):
        mu = jnp.mean(v, axis=-1, keepdims=True)
        var = jnp.mean((v - mu) ** 2, axis=-1, keepdims=True)
        return (v - mu) / jnp.sqrt(var + EPS) * g + beta

    def mha(q_in, kv_in, wq, wk, wv, wo, mask):
        q = q_in @ wq
        k = kv_in @ wk
        v = kv_in @ wv

        def split(t):  # (B,L,H) -> (B,heads,L,DH)
            Bn, L, _ = t.shape
            return t.reshape(Bn, L, NUM_HEADS, DH).transpose(0, 2, 1, 3)

        qh, kh, vh = split(q), split(k), split(v)
        scores = jnp.einsum("bhqd,bhkd->bhqk", qh, kh) / math.sqrt(DH)
        scores = jnp.where(mask[:, None, :, :], scores, NEG)
        attn = jax.nn.softmax(scores, axis=-1)
        ctx = jnp.einsum("bhqk,bhkd->bhqd", attn, vh)
        ctx = ctx.transpose(0, 2, 1, 3).reshape(q.shape)
        return ctx @ wo

    causal = (jnp.arange(T)[None, :] <= jnp.arange(T)[:, None])[None].repeat(B, 0)
    enc_mask = (jnp.arange(TE)[None, :] < enc_valid_lens[:, None])[:, None, :]
    enc_mask = jnp.broadcast_to(enc_mask, (B, T, TE))

    X2 = mha(x, x, params["wq1"], params["wk1"], params["wv1"], params["wo1"], causal)
    Y = layer_norm(X2 + x, params["g1"], params["be1"])
    Y2 = mha(Y, enc_outputs, params["wq2"], params["wk2"], params["wv2"],
             params["wo2"], enc_mask)
    Z = layer_norm(Y2 + Y, params["g2"], params["be2"])
    ffn = jnp.maximum(x @ params["w1"] + params["b1"], 0.0) @ params["w2"] + params["b2"]
    return layer_norm(ffn + Z, params["g3"], params["be3"])


# ---------------------------------- main ----------------------------------------
if __name__ == "__main__":
    key = jax.random.PRNGKey(0)
    ks = jax.random.split(key, 24)

    def lin_w(k, fan_in, fan_out):
        # PyTorch nn.Linear stores W as (out, in); transpose to (in, out) for x @ W.
        w_torch_layout = 0.1 * jax.random.normal(k, (fan_out, fan_in), jnp.float32)
        return w_torch_layout.T

    params = {
        "wq1": lin_w(ks[0], H, H), "wk1": lin_w(ks[1], H, H),
        "wv1": lin_w(ks[2], H, H), "wo1": lin_w(ks[3], H, H),
        "wq2": lin_w(ks[4], H, H), "wk2": lin_w(ks[5], H, H),
        "wv2": lin_w(ks[6], H, H), "wo2": lin_w(ks[7], H, H),
        "w1": lin_w(ks[8], H, FFN_H),
        "b1": 0.1 * jax.random.normal(ks[9], (1, FFN_H), jnp.float32),
        "w2": lin_w(ks[10], FFN_H, H),
        "b2": 0.1 * jax.random.normal(ks[11], (1, H), jnp.float32),
        "g1": 1.0 + 0.1 * jax.random.normal(ks[12], (1, H), jnp.float32),
        "be1": 0.1 * jax.random.normal(ks[13], (1, H), jnp.float32),
        "g2": 1.0 + 0.1 * jax.random.normal(ks[14], (1, H), jnp.float32),
        "be2": 0.1 * jax.random.normal(ks[15], (1, H), jnp.float32),
        "g3": 1.0 + 0.1 * jax.random.normal(ks[16], (1, H), jnp.float32),
        "be3": 0.1 * jax.random.normal(ks[17], (1, H), jnp.float32),
    }

    x = jax.random.normal(ks[18], (B, T, H), jnp.float32)
    enc_outputs = jax.random.normal(ks[19], (B, TE, H), jnp.float32)
    enc_valid_lens = jnp.array([5, 8], dtype=jnp.int32)

    # Packing happens exactly once (not per forward call).
    packed = pack_params(params)
    packed = jax.tree_util.tree_map(jax.block_until_ready, packed)

    out = transformer_decoder_block(x, enc_outputs, enc_valid_lens, packed)
    out = jax.block_until_ready(out)

    ref = reference(x, enc_outputs, enc_valid_lens, params)
    # Tolerance justification (per review): the only numerics deviation from the
    # f32 PyTorch module is the bf16 cast of MXU operands (weights + activations,
    # f32 accumulation). bf16 rounding (~2^-8 relative) accumulated over the
    # three sequential sublayers + three LayerNorms bounds the error well below
    # this tolerance; softmax now uses exact division (approx reciprocal removed).
    np.testing.assert_allclose(np.asarray(out), np.asarray(ref), rtol=5e-2, atol=5e-2)

    print("KERNEL_OK")
</pallas_src>

<mosaic_0001>
module attributes {stable_mosaic.version = 11 : i64} {
  func.func @decoder_block_kernel(%arg0: memref<16x32xf32, #tpu.memory_space<vmem>>, %arg1: memref<16x32xf32, #tpu.memory_space<vmem>>, %arg2: memref<2xi32, #tpu.memory_space<smem>>, %arg3: memref<32x160xbf16, #tpu.memory_space<vmem>>, %arg4: memref<32x160xbf16, #tpu.memory_space<vmem>>, %arg5: memref<64x32xbf16, #tpu.memory_space<vmem>>, %arg6: memref<8x64xf32, #tpu.memory_space<vmem>>, %arg7: memref<16x32xf32, #tpu.memory_space<vmem>>, %arg8: memref<16x32xf32, #tpu.memory_space<vmem>>) attributes {dimension_semantics = [], scalar_prefetch = 0 : i64, scratch_operands = 1 : i64, tpu.core_type = #tpu.core_type<tc>} {
    %c0 = arith.constant 0 : index
    %c0_0 = arith.constant 0 : index
    %0 = vector.load %arg0[%c0, %c0_0] : memref<16x32xf32, #tpu.memory_space<vmem>>, vector<16x32xf32>
    %c0_1 = arith.constant 0 : index
    %c0_2 = arith.constant 0 : index
    %1 = vector.load %arg1[%c0_1, %c0_2] : memref<16x32xf32, #tpu.memory_space<vmem>>, vector<16x32xf32>
    %c0_3 = arith.constant 0 : index
    %c0_4 = arith.constant 0 : index
    %2 = vector.load %arg6[%c0_3, %c0_4] : memref<8x64xf32, #tpu.memory_space<vmem>>, vector<8x64xf32>
    %3 = vector.extract_strided_slice %2 {offsets = [0, 0], sizes = [1, 64], strides = [1, 1]} : vector<8x64xf32> to vector<1x64xf32>
    %4 = vector.extract_strided_slice %2 {offsets = [1, 0], sizes = [1, 32], strides = [1, 1]} : vector<8x64xf32> to vector<1x32xf32>
    %5 = vector.extract_strided_slice %2 {offsets = [2, 0], sizes = [1, 32], strides = [1, 1]} : vector<8x64xf32> to vector<1x32xf32>
    %6 = vector.extract_strided_slice %2 {offsets = [3, 0], sizes = [1, 32], strides = [1, 1]} : vector<8x64xf32> to vector<1x32xf32>
    %7 = vector.extract_strided_slice %2 {offsets = [4, 0], sizes = [1, 32], strides = [1, 1]} : vector<8x64xf32> to vector<1x32xf32>
    %8 = vector.extract_strided_slice %2 {offsets = [5, 0], sizes = [1, 32], strides = [1, 1]} : vector<8x64xf32> to vector<1x32xf32>
    %9 = vector.extract_strided_slice %2 {offsets = [6, 0], sizes = [1, 32], strides = [1, 1]} : vector<8x64xf32> to vector<1x32xf32>
    %10 = vector.extract_strided_slice %2 {offsets = [7, 0], sizes = [1, 32], strides = [1, 1]} : vector<8x64xf32> to vector<1x32xf32>
    %11 = arith.truncf %0 : vector<16x32xf32> to vector<16x32xbf16>
    %c0_5 = arith.constant 0 : index
    %c0_6 = arith.constant 0 : index
    %12 = vector.load %arg3[%c0_5, %c0_6] : memref<32x160xbf16, #tpu.memory_space<vmem>>, vector<32x160xbf16>
    %cst = arith.constant dense<0.000000e+00> : vector<16x160xf32>
    %13 = tpu.matmul %11, %12, %cst {dimension_numbers = #tpu.dot_dimension_numbers<[1], [0], [0], [1], [0, 0, 1, 1], [], []>} : vector<16x32xbf16>, vector<32x160xbf16>, vector<16x160xf32> -> vector<16x160xf32>
    %14 = tpu.iota {dimensions = array<i32: 1>} : vector<1x8x8xi32>
    %15 = tpu.iota {dimensions = array<i32: 2>} : vector<1x8x8xi32>
    %16 = arith.cmpi sle, %15, %14 : vector<1x8x8xi32>
    %17 = vector.extract_strided_slice %13 {offsets = [0, 0], sizes = [16, 32], strides = [1, 1]} : vector<16x160xf32> to vector<16x32xf32>
    %18 = vector.extract_strided_slice %13 {offsets = [0, 32], sizes = [16, 32], strides = [1, 1]} : vector<16x160xf32> to vector<16x32xf32>
    %19 = vector.extract_strided_slice %13 {offsets = [0, 64], sizes = [16, 32], strides = [1, 1]} : vector<16x160xf32> to vector<16x32xf32>
    %c0_7 = arith.constant 0 : index
    %c0_8 = arith.constant 0 : index
    %20 = vector.load %arg4[%c0_7, %c0_8] : memref<32x160xbf16, #tpu.memory_space<vmem>>, vector<32x32xbf16>
    %21 = vector.extract_strided_slice %17 {offsets = [0, 0], sizes = [16, 8], strides = [1, 1]} : vector<16x32xf32> to vector<16x8xf32>
    %22 = vector.shape_cast %21 : vector<16x8xf32> to vector<2x8x8xf32>
    %23 = arith.truncf %22 : vector<2x8x8xf32> to vector<2x8x8xbf16>
    %24 = vector.extract_strided_slice %18 {offsets = [0, 0], sizes = [16, 8], strides = [1, 1]} : vector<16x32xf32> to vector<16x8xf32>
    %25 = vector.shape_cast %24 : vector<16x8xf32> to vector<2x8x8xf32>
    %26 = arith.truncf %25 : vector<2x8x8xf32> to vector<2x8x8xbf16>
    %27 = vector.extract_strided_slice %19 {offsets = [0, 0], sizes = [16, 8], strides = [1, 1]} : vector<16x32xf32> to vector<16x8xf32>
    %28 = vector.shape_cast %27 : vector<16x8xf32> to vector<2x8x8xf32>
    %29 = arith.truncf %28 : vector<2x8x8xf32> to vector<2x8x8xbf16>
    "tpu.trace_start"() <{level = 10 : i32, message = "bqd,bkd->bqk"}> : () -> ()
    %cst_9 = arith.constant dense<0.000000e+00> : vector<2x8x8xf32>
    %30 = tpu.matmul %23, %26, %cst_9 {dimension_numbers = #tpu.dot_dimension_numbers<[2], [2], [1], [1], [0, 0, 0, 1, 1, 1], [0], [0]>} : vector<2x8x8xbf16>, vector<2x8x8xbf16>, vector<2x8x8xf32> -> vector<2x8x8xf32>
    "tpu.trace_stop"() : () -> ()
    %cst_10 = arith.constant 0.353553385 : f32
    %31 = vector.broadcast %cst_10 : f32 to vector<2x8x8xf32>
    %32 = arith.mulf %30, %31 : vector<2x8x8xf32>
    %cst_11 = arith.constant -1.000000e+06 : f32
    %33 = vector.shape_cast %16 : vector<1x8x8xi1> to vector<1x8x8xi1>
    %34 = vector.broadcast %33 : vector<1x8x8xi1> to vector<2x8x8xi1>
    %35 = vector.broadcast %cst_11 : f32 to vector<2x8x8xf32>
    %36 = arith.select %34, %32, %35 : vector<2x8x8xi1>, vector<2x8x8xf32>
    %cst_12 = arith.constant dense<0xFF800000> : vector<2x8xf32>
    %37 = vector.multi_reduction <maximumf>, %36, %cst_12 [2] : vector<2x8x8xf32> to vector<2x8xf32>
    %38 = vector.shape_cast %37 : vector<2x8xf32> to vector<2x8x1xf32>
    %39 = vector.broadcast %38 : vector<2x8x1xf32> to vector<2x8x8xf32>
    %40 = arith.subf %36, %39 : vector<2x8x8xf32>
    %41 = math.exp %40 : vector<2x8x8xf32>
    %cst_13 = arith.constant dense<0.000000e+00> : vector<2x8xf32>
    %42 = vector.multi_reduction <add>, %41, %cst_13 [2] : vector<2x8x8xf32> to vector<2x8xf32>
    %43 = vector.shape_cast %42 : vector<2x8xf32> to vector<2x8x1xf32>
    %44 = vector.broadcast %43 : vector<2x8x1xf32> to vector<2x8x8xf32>
    %45 = arith.divf %41, %44 : vector<2x8x8xf32>
    %46 = arith.truncf %45 : vector<2x8x8xf32> to vector<2x8x8xbf16>
    "tpu.trace_start"() <{level = 10 : i32, message = "bqk,bkd->bqd"}> : () -> ()
    %cst_14 = arith.constant dense<0.000000e+00> : vector<2x8x8xf32>
    %47 = tpu.matmul %46, %29, %cst_14 {dimension_numbers = #tpu.dot_dimension_numbers<[2], [1], [1], [2], [0, 0, 0, 1, 1, 2], [0], [0]>} : vector<2x8x8xbf16>, vector<2x8x8xbf16>, vector<2x8x8xf32> -> vector<2x8x8xf32>
    "tpu.trace_stop"() : () -> ()
    %48 = vector.shape_cast %47 : vector<2x8x8xf32> to vector<16x8xf32>
    %c0_15 = arith.constant 0 : index
    %c0_16 = arith.constant 0 : index
    %49 = vector.load %arg8[%c0_15, %c0_16] : memref<16x32xf32, #tpu.memory_space<vmem>>, vector<16x8xf32>
    tpu.vector_store %arg8[%c0_15, %c0_16], %48 {strides = array<i32>} : memref<16x32xf32, #tpu.memory_space<vmem>>, vector<16x8xf32>,
    %50 = vector.extract_strided_slice %17 {offsets = [0, 8], sizes = [16, 8], strides = [1, 1]} : vector<16x32xf32> to vector<16x8xf32>
    %51 = vector.shape_cast %50 : vector<16x8xf32> to vector<2x8x8xf32>
    %52 = arith.truncf %51 : vector<2x8x8xf32> to vector<2x8x8xbf16>
    %53 = vector.extract_strided_slice %18 {offsets = [0, 8], sizes = [16, 8], strides = [1, 1]} : vector<16x32xf32> to vector<16x8xf32>
    %54 = vector.shape_cast %53 : vector<16x8xf32> to vector<2x8x8xf32>
    %55 = arith.truncf %54 : vector<2x8x8xf32> to vector<2x8x8xbf16>
    %56 = vector.extract_strided_slice %19 {offsets = [0, 8], sizes = [16, 8], strides = [1, 1]} : vector<16x32xf32> to vector<16x8xf32>
    %57 = vector.shape_cast %56 : vector<16x8xf32> to vector<2x8x8xf32>
    %58 = arith.truncf %57 : vector<2x8x8xf32> to vector<2x8x8xbf16>
    "tpu.trace_start"() <{level = 10 : i32, message = "bqd,bkd->bqk"}> : () -> ()
    %cst_17 = arith.constant dense<0.000000e+00> : vector<2x8x8xf32>
    %59 = tpu.matmul %52, %55, %cst_17 {dimension_numbers = #tpu.dot_dimension_numbers<[2], [2], [1], [1], [0, 0, 0, 1, 1, 1], [0], [0]>} : vector<2x8x8xbf16>, vector<2x8x8xbf16>, vector<2x8x8xf32> -> vector<2x8x8xf32>
    "tpu.trace_stop"() : () -> ()
    %cst_18 = arith.constant 0.353553385 : f32
    %60 = vector.broadcast %cst_18 : f32 to vector<2x8x8xf32>
    %61 = arith.mulf %59, %60 : vector<2x8x8xf32>
    %cst_19 = arith.constant -1.000000e+06 : f32
    %62 = vector.shape_cast %16 : vector<1x8x8xi1> to vector<1x8x8xi1>
    %63 = vector.broadcast %62 : vector<1x8x8xi1> to vector<2x8x8xi1>
    %64 = vector.broadcast %cst_19 : f32 to vector<2x8x8xf32>
    %65 = arith.select %63, %61, %64 : vector<2x8x8xi1>, vector<2x8x8xf32>
    %cst_20 = arith.constant dense<0xFF800000> : vector<2x8xf32>
    %66 = vector.multi_reduction <maximumf>, %65, %cst_20 [2] : vector<2x8x8xf32> to vector<2x8xf32>
    %67 = vector.shape_cast %66 : vector<2x8xf32> to vector<2x8x1xf32>
    %68 = vector.broadcast %67 : vector<2x8x1xf32> to vector<2x8x8xf32>
    %69 = arith.subf %65, %68 : vector<2x8x8xf32>
    %70 = math.exp %69 : vector<2x8x8xf32>
    %cst_21 = arith.constant dense<0.000000e+00> : vector<2x8xf32>
    %71 = vector.multi_reduction <add>, %70, %cst_21 [2] : vector<2x8x8xf32> to vector<2x8xf32>
    %72 = vector.shape_cast %71 : vector<2x8xf32> to vector<2x8x1xf32>
    %73 = vector.broadcast %72 : vector<2x8x1xf32> to vector<2x8x8xf32>
    %74 = arith.divf %70, %73 : vector<2x8x8xf32>
    %75 = arith.truncf %74 : vector<2x8x8xf32> to vector<2x8x8xbf16>
    "tpu.trace_start"() <{level = 10 : i32, message = "bqk,bkd->bqd"}> : () -> ()
    %cst_22 = arith.constant dense<0.000000e+00> : vector<2x8x8xf32>
    %76 = tpu.matmul %75, %58, %cst_22 {dimension_numbers = #tpu.dot_dimension_numbers<[2], [1], [1], [2], [0, 0, 0, 1, 1, 2], [0], [0]>} : vector<2x8x8xbf16>, vector<2x8x8xbf16>, vector<2x8x8xf32> -> vector<2x8x8xf32>
    "tpu.trace_stop"() : () -> ()
    %77 = vector.shape_cast %76 : vector<2x8x8xf32> to vector<16x8xf32>
    %c0_23 = arith.constant 0 : index
    %c8 = arith.constant 8 : index
    %78 = vector.load %arg8[%c0_23, %c8] : memref<16x32xf32, #tpu.memory_space<vmem>>, vector<16x8xf32>
    tpu.vector_store %arg8[%c0_23, %c8], %77 {strides = array<i32>} : memref<16x32xf32, #tpu.memory_space<vmem>>, vector<16x8xf32>,
    %79 = vector.extract_strided_slice %17 {offsets = [0, 16], sizes = [16, 8], strides = [1, 1]} : vector<16x32xf32> to vector<16x8xf32>
    %80 = vector.shape_cast %79 : vector<16x8xf32> to vector<2x8x8xf32>
    %81 = arith.truncf %80 : vector<2x8x8xf32> to vector<2x8x8xbf16>
    %82 = vector.extract_strided_slice %18 {offsets = [0, 16], sizes = [16, 8], strides = [1, 1]} : vector<16x32xf32> to vector<16x8xf32>
    %83 = vector.shape_cast %82 : vector<16x8xf32> to vector<2x8x8xf32>
    %84 = arith.truncf %83 : vector<2x8x8xf32> to vector<2x8x8xbf16>
    %85 = vector.extract_strided_slice %19 {offsets = [0, 16], sizes = [16, 8], strides = [1, 1]} : vector<16x32xf32> to vector<16x8xf32>
    %86 = vector.shape_cast %85 : vector<16x8xf32> to vector<2x8x8xf32>
    %87 = arith.truncf %86 : vector<2x8x8xf32> to vector<2x8x8xbf16>
    "tpu.trace_start"() <{level = 10 : i32, message = "bqd,bkd->bqk"}> : () -> ()
    %cst_24 = arith.constant dense<0.000000e+00> : vector<2x8x8xf32>
    %88 = tpu.matmul %81, %84, %cst_24 {dimension_numbers = #tpu.dot_dimension_numbers<[2], [2], [1], [1], [0, 0, 0, 1, 1, 1], [0], [0]>} : vector<2x8x8xbf16>, vector<2x8x8xbf16>, vector<2x8x8xf32> -> vector<2x8x8xf32>
    "tpu.trace_stop"() : () -> ()
    %cst_25 = arith.constant 0.353553385 : f32
    %89 = vector.broadcast %cst_25 : f32 to vector<2x8x8xf32>
    %90 = arith.mulf %88, %89 : vector<2x8x8xf32>
    %cst_26 = arith.constant -1.000000e+06 : f32
    %91 = vector.shape_cast %16 : vector<1x8x8xi1> to vector<1x8x8xi1>
    %92 = vector.broadcast %91 : vector<1x8x8xi1> to vector<2x8x8xi1>
    %93 = vector.broadcast %cst_26 : f32 to vector<2x8x8xf32>
    %94 = arith.select %92, %90, %93 : vector<2x8x8xi1>, vector<2x8x8xf32>
    %cst_27 = arith.constant dense<0xFF800000> : vector<2x8xf32>
    %95 = vector.multi_reduction <maximumf>, %94, %cst_27 [2] : vector<2x8x8xf32> to vector<2x8xf32>
    %96 = vector.shape_cast %95 : vector<2x8xf32> to vector<2x8x1xf32>
    %97 = vector.broadcast %96 : vector<2x8x1xf32> to vector<2x8x8xf32>
    %98 = arith.subf %94, %97 : vector<2x8x8xf32>
    %99 = math.exp %98 : vector<2x8x8xf32>
    %cst_28 = arith.constant dense<0.000000e+00> : vector<2x8xf32>
    %100 = vector.multi_reduction <add>, %99, %cst_28 [2] : vector<2x8x8xf32> to vector<2x8xf32>
    %101 = vector.shape_cast %100 : vector<2x8xf32> to vector<2x8x1xf32>
    %102 = vector.broadcast %101 : vector<2x8x1xf32> to vector<2x8x8xf32>
    %103 = arith.divf %99, %102 : vector<2x8x8xf32>
    %104 = arith.truncf %103 : vector<2x8x8xf32> to vector<2x8x8xbf16>
    "tpu.trace_start"() <{level = 10 : i32, message = "bqk,bkd->bqd"}> : () -> ()
    %cst_29 = arith.constant dense<0.000000e+00> : vector<2x8x8xf32>
    %105 = tpu.matmul %104, %87, %cst_29 {dimension_numbers = #tpu.dot_dimension_numbers<[2], [1], [1], [2], [0, 0, 0, 1, 1, 2], [0], [0]>} : vector<2x8x8xbf16>, vector<2x8x8xbf16>, vector<2x8x8xf32> -> vector<2x8x8xf32>
    "tpu.trace_stop"() : () -> ()
    %106 = vector.shape_cast %105 : vector<2x8x8xf32> to vector<16x8xf32>
    %c0_30 = arith.constant 0 : index
    %c16 = arith.constant 16 : index
    %107 = vector.load %arg8[%c0_30, %c16] : memref<16x32xf32, #tpu.memory_space<vmem>>, vector<16x8xf32>
    tpu.vector_store %arg8[%c0_30, %c16], %106 {strides = array<i32>} : memref<16x32xf32, #tpu.memory_space<vmem>>, vector<16x8xf32>,
    %108 = vector.extract_strided_slice %17 {offsets = [0, 24], sizes = [16, 8], strides = [1, 1]} : vector<16x32xf32> to vector<16x8xf32>
    %109 = vector.shape_cast %108 : vector<16x8xf32> to vector<2x8x8xf32>
    %110 = arith.truncf %109 : vector<2x8x8xf32> to vector<2x8x8xbf16>
    %111 = vector.extract_strided_slice %18 {offsets = [0, 24], sizes = [16, 8], strides = [1, 1]} : vector<16x32xf32> to vector<16x8xf32>
    %112 = vector.shape_cast %111 : vector<16x8xf32> to vector<2x8x8xf32>
    %113 = arith.truncf %112 : vector<2x8x8xf32> to vector<2x8x8xbf16>
    %114 = vector.extract_strided_slice %19 {offsets = [0, 24], sizes = [16, 8], strides = [1, 1]} : vector<16x32xf32> to vector<16x8xf32>
    %115 = vector.shape_cast %114 : vector<16x8xf32> to vector<2x8x8xf32>
    %116 = arith.truncf %115 : vector<2x8x8xf32> to vector<2x8x8xbf16>
    "tpu.trace_start"() <{level = 10 : i32, message = "bqd,bkd->bqk"}> : () -> ()
    %cst_31 = arith.constant dense<0.000000e+00> : vector<2x8x8xf32>
    %117 = tpu.matmul %110, %113, %cst_31 {dimension_numbers = #tpu.dot_dimension_numbers<[2], [2], [1], [1], [0, 0, 0, 1, 1, 1], [0], [0]>} : vector<2x8x8xbf16>, vector<2x8x8xbf16>, vector<2x8x8xf32> -> vector<2x8x8xf32>
    "tpu.trace_stop"() : () -> ()
    %cst_32 = arith.constant 0.353553385 : f32
    %118 = vector.broadcast %cst_32 : f32 to vector<2x8x8xf32>
    %119 = arith.mulf %117, %118 : vector<2x8x8xf32>
    %cst_33 = arith.constant -1.000000e+06 : f32
    %120 = vector.shape_cast %16 : vector<1x8x8xi1> to vector<1x8x8xi1>
    %121 = vector.broadcast %120 : vector<1x8x8xi1> to vector<2x8x8xi1>
    %122 = vector.broadcast %cst_33 : f32 to vector<2x8x8xf32>
    %123 = arith.select %121, %119, %122 : vector<2x8x8xi1>, vector<2x8x8xf32>
    %cst_34 = arith.constant dense<0xFF800000> : vector<2x8xf32>
    %124 = vector.multi_reduction <maximumf>, %123, %cst_34 [2] : vector<2x8x8xf32> to vector<2x8xf32>
    %125 = vector.shape_cast %124 : vector<2x8xf32> to vector<2x8x1xf32>
    %126 = vector.broadcast %125 : vector<2x8x1xf32> to vector<2x8x8xf32>
    %127 = arith.subf %123, %126 : vector<2x8x8xf32>
    %128 = math.exp %127 : vector<2x8x8xf32>
    %cst_35 = arith.constant dense<0.000000e+00> : vector<2x8xf32>
    %129 = vector.multi_reduction <add>, %128, %cst_35 [2] : vector<2x8x8xf32> to vector<2x8xf32>
    %130 = vector.shape_cast %129 : vector<2x8xf32> to vector<2x8x1xf32>
    %131 = vector.broadcast %130 : vector<2x8x1xf32> to vector<2x8x8xf32>
    %132 = arith.divf %128, %131 : vector<2x8x8xf32>
    %133 = arith.truncf %132 : vector<2x8x8xf32> to vector<2x8x8xbf16>
    "tpu.trace_start"() <{level = 10 : i32, message = "bqk,bkd->bqd"}> : () -> ()
    %cst_36 = arith.constant dense<0.000000e+00> : vector<2x8x8xf32>
    %134 = tpu.matmul %133, %116, %cst_36 {dimension_numbers = #tpu.dot_dimension_numbers<[2], [1], [1], [2], [0, 0, 0, 1, 1, 2], [0], [0]>} : vector<2x8x8xbf16>, vector<2x8x8xbf16>, vector<2x8x8xf32> -> vector<2x8x8xf32>
    "tpu.trace_stop"() : () -> ()
    %135 = vector.shape_cast %134 : vector<2x8x8xf32> to vector<16x8xf32>
    %c0_37 = arith.constant 0 : index
    %c24 = arith.constant 24 : index
    %136 = vector.load %arg8[%c0_37, %c24] : memref<16x32xf32, #tpu.memory_space<vmem>>, vector<16x8xf32>
    tpu.vector_store %arg8[%c0_37, %c24], %135 {strides = array<i32>} : memref<16x32xf32, #tpu.memory_space<vmem>>, vector<16x8xf32>,
    %c0_38 = arith.constant 0 : index
    %c0_39 = arith.constant 0 : index
    %137 = vector.load %arg8[%c0_38, %c0_39] : memref<16x32xf32, #tpu.memory_space<vmem>>, vector<16x32xf32>
    %138 = arith.truncf %137 : vector<16x32xf32> to vector<16x32xbf16>
    %cst_40 = arith.constant dense<0.000000e+00> : vector<16x32xf32>
    %139 = tpu.matmul %138, %20, %cst_40 {dimension_numbers = #tpu.dot_dimension_numbers<[1], [0], [0], [1], [0, 0, 1, 1], [], []>} : vector<16x32xbf16>, vector<32x32xbf16>, vector<16x32xf32> -> vector<16x32xf32>
    %140 = arith.addf %139, %0 : vector<16x32xf32>
    %cst_41 = arith.constant dense<0.000000e+00> : vector<16xf32>
    %141 = vector.multi_reduction <add>, %140, %cst_41 [1] : vector<16x32xf32> to vector<16xf32>
    %142 = vector.shape_cast %141 : vector<16xf32> to vector<16x1xf32>
    %cst_42 = arith.constant 3.200000e+01 : f32
    %143 = vector.broadcast %cst_42 : f32 to vector<16x1xf32>
    %144 = arith.divf %142, %143 : vector<16x1xf32>
    %145 = vector.broadcast %144 : vector<16x1xf32> to vector<16x32xf32>
    %146 = arith.subf %140, %145 : vector<16x32xf32>
    %147 = arith.mulf %146, %146 : vector<16x32xf32>
    %cst_43 = arith.constant dense<0.000000e+00> : vector<16xf32>
    %148 = vector.multi_reduction <add>, %147, %cst_43 [1] : vector<16x32xf32> to vector<16xf32>
    %149 = vector.shape_cast %148 : vector<16xf32> to vector<16x1xf32>
    %cst_44 = arith.constant 3.200000e+01 : f32
    %150 = vector.broadcast %cst_44 : f32 to vector<16x1xf32>
    %151 = arith.divf %149, %150 : vector<16x1xf32>
    %cst_45 = arith.constant 9.99999974E-6 : f32
    %152 = vector.broadcast %cst_45 : f32 to vector<16x1xf32>
    %153 = arith.addf %151, %152 : vector<16x1xf32>
    %154 = math.rsqrt %153 : vector<16x1xf32>
    %155 = vector.broadcast %154 : vector<16x1xf32> to vector<16x32xf32>
    %156 = arith.mulf %146, %155 : vector<16x32xf32>
    %157 = vector.broadcast %5 : vector<1x32xf32> to vector<16x32xf32>
    %158 = arith.mulf %156, %157 : vector<16x32xf32>
    %159 = vector.broadcast %6 : vector<1x32xf32> to vector<16x32xf32>
    %160 = arith.addf %158, %159 : vector<16x32xf32>
    %161 = arith.truncf %160 : vector<16x32xf32> to vector<16x32xbf16>
    %c0_46 = arith.constant 0 : index
    %c32 = arith.constant 32 : index
    %162 = vector.load %arg4[%c0_46, %c32] : memref<32x160xbf16, #tpu.memory_space<vmem>>, vector<32x32xbf16>
    %cst_47 = arith.constant dense<0.000000e+00> : vector<16x32xf32>
    %163 = tpu.matmul %161, %162, %cst_47 {dimension_numbers = #tpu.dot_dimension_numbers<[1], [0], [0], [1], [0, 0, 1, 1], [], []>} : vector<16x32xbf16>, vector<32x32xbf16>, vector<16x32xf32> -> vector<16x32xf32>
    %164 = arith.truncf %1 : vector<16x32xf32> to vector<16x32xbf16>
    %c0_48 = arith.constant 0 : index
    %c64 = arith.constant 64 : index
    %165 = vector.load %arg4[%c0_48, %c64] : memref<32x160xbf16, #tpu.memory_space<vmem>>, vector<32x64xbf16>
    %cst_49 = arith.constant dense<0.000000e+00> : vector<16x64xf32>
    %166 = tpu.matmul %164, %165, %cst_49 {dimension_numbers = #tpu.dot_dimension_numbers<[1], [0], [0], [1], [0, 0, 1, 1], [], []>} : vector<16x32xbf16>, vector<32x64xbf16>, vector<16x64xf32> -> vector<16x64xf32>
    %167 = tpu.iota {dimensions = array<i32: 2>} : vector<2x8x8xi32>
    %168 = tpu.iota {dimensions = array<i32: 0>} : vector<2x8x8xi32>
    %c0_50 = arith.constant 0 : index
    %169 = memref.load %arg2[%c0_50] : memref<2xi32, #tpu.memory_space<smem>>
    %170 = vector.broadcast %169 : i32 to vector<2x8x8xi32>
    %c1_i32 = arith.constant 1 : i32
    %171 = vector.broadcast %c1_i32 : i32 to vector<2x8x8xi32>
    %172 = arith.cmpi eq, %168, %171 : vector<2x8x8xi32>
    %c1 = arith.constant 1 : index
    %173 = memref.load %arg2[%c1] : memref<2xi32, #tpu.memory_space<smem>>
    %174 = vector.broadcast %173 : i32 to vector<2x8x8xi32>
    %175 = arith.select %172, %174, %170 : vector<2x8x8xi1>, vector<2x8x8xi32>
    %176 = arith.cmpi slt, %167, %175 : vector<2x8x8xi32>
    %177 = vector.extract_strided_slice %166 {offsets = [0, 0], sizes = [16, 32], strides = [1, 1]} : vector<16x64xf32> to vector<16x32xf32>
    %178 = vector.extract_strided_slice %166 {offsets = [0, 32], sizes = [16, 32], strides = [1, 1]} : vector<16x64xf32> to vector<16x32xf32>
    %c0_51 = arith.constant 0 : index
    %c128 = arith.constant 128 : index
    %179 = vector.load %arg4[%c0_51, %c128] : memref<32x160xbf16, #tpu.memory_space<vmem>>, vector<32x32xbf16>
    %180 = vector.extract_strided_slice %163 {offsets = [0, 0], sizes = [16, 8], strides = [1, 1]} : vector<16x32xf32> to vector<16x8xf32>
    %181 = vector.shape_cast %180 : vector<16x8xf32> to vector<2x8x8xf32>
    %182 = arith.truncf %181 : vector<2x8x8xf32> to vector<2x8x8xbf16>
    %183 = vector.extract_strided_slice %177 {offsets = [0, 0], sizes = [16, 8], strides = [1, 1]} : vector<16x32xf32> to vector<16x8xf32>
    %184 = vector.shape_cast %183 : vector<16x8xf32> to vector<2x8x8xf32>
    %185 = arith.truncf %184 : vector<2x8x8xf32> to vector<2x8x8xbf16>
    %186 = vector.extract_strided_slice %178 {offsets = [0, 0], sizes = [16, 8], strides = [1, 1]} : vector<16x32xf32> to vector<16x8xf32>
    %187 = vector.shape_cast %186 : vector<16x8xf32> to vector<2x8x8xf32>
    %188 = arith.truncf %187 : vector<2x8x8xf32> to vector<2x8x8xbf16>
    "tpu.trace_start"() <{level = 10 : i32, message = "bqd,bkd->bqk"}> : () -> ()
    %cst_52 = arith.constant dense<0.000000e+00> : vector<2x8x8xf32>
    %189 = tpu.matmul %182, %185, %cst_52 {dimension_numbers = #tpu.dot_dimension_numbers<[2], [2], [1], [1], [0, 0, 0, 1, 1, 1], [0], [0]>} : vector<2x8x8xbf16>, vector<2x8x8xbf16>, vector<2x8x8xf32> -> vector<2x8x8xf32>
    "tpu.trace_stop"() : () -> ()
    %cst_53 = arith.constant 0.353553385 : f32
    %190 = vector.broadcast %cst_53 : f32 to vector<2x8x8xf32>
    %191 = arith.mulf %189, %190 : vector<2x8x8xf32>
    %cst_54 = arith.constant -1.000000e+06 : f32
    %192 = vector.broadcast %cst_54 : f32 to vector<2x8x8xf32>
    %193 = arith.select %176, %191, %192 : vector<2x8x8xi1>, vector<2x8x8xf32>
    %cst_55 = arith.constant dense<0xFF800000> : vector<2x8xf32>
    %194 = vector.multi_reduction <maximumf>, %193, %cst_55 [2] : vector<2x8x8xf32> to vector<2x8xf32>
    %195 = vector.shape_cast %194 : vector<2x8xf32> to vector<2x8x1xf32>
    %196 = vector.broadcast %195 : vector<2x8x1xf32> to vector<2x8x8xf32>
    %197 = arith.subf %193, %196 : vector<2x8x8xf32>
    %198 = math.exp %197 : vector<2x8x8xf32>
    %cst_56 = arith.constant dense<0.000000e+00> : vector<2x8xf32>
    %199 = vector.multi_reduction <add>, %198, %cst_56 [2] : vector<2x8x8xf32> to vector<2x8xf32>
    %200 = vector.shape_cast %199 : vector<2x8xf32> to vector<2x8x1xf32>
    %201 = vector.broadcast %200 : vector<2x8x1xf32> to vector<2x8x8xf32>
    %202 = arith.divf %198, %201 : vector<2x8x8xf32>
    %203 = arith.truncf %202 : vector<2x8x8xf32> to vector<2x8x8xbf16>
    "tpu.trace_start"() <{level = 10 : i32, message = "bqk,bkd->bqd"}> : () -> ()
    %cst_57 = arith.constant dense<0.000000e+00> : vector<2x8x8xf32>
    %204 = tpu.matmul %203, %188, %cst_57 {dimension_numbers = #tpu.dot_dimension_numbers<[2], [1], [1], [2], [0, 0, 0, 1, 1, 2], [0], [0]>} : vector<2x8x8xbf16>, vector<2x8x8xbf16>, vector<2x8x8xf32> -> vector<2x8x8xf32>
    "tpu.trace_stop"() : () -> ()
    %205 = vector.shape_cast %204 : vector<2x8x8xf32> to vector<16x8xf32>
    %c0_58 = arith.constant 0 : index
    %c0_59 = arith.constant 0 : index
    %206 = vector.load %arg8[%c0_58, %c0_59] : memref<16x32xf32, #tpu.memory_space<vmem>>, vector<16x8xf32>
    tpu.vector_store %arg8[%c0_58, %c0_59], %205 {strides = array<i32>} : memref<16x32xf32, #tpu.memory_space<vmem>>, vector<16x8xf32>,
    %207 = vector.extract_strided_slice %163 {offsets = [0, 8], sizes = [16, 8], strides = [1, 1]} : vector<16x32xf32> to vector<16x8xf32>
    %208 = vector.shape_cast %207 : vector<16x8xf32> to vector<2x8x8xf32>
    %209 = arith.truncf %208 : vector<2x8x8xf32> to vector<2x8x8xbf16>
    %210 = vector.extract_strided_slice %177 {offsets = [0, 8], sizes = [16, 8], strides = [1, 1]} : vector<16x32xf32> to vector<16x8xf32>
    %211 = vector.shape_cast %210 : vector<16x8xf32> to vector<2x8x8xf32>
    %212 = arith.truncf %211 : vector<2x8x8xf32> to vector<2x8x8xbf16>
    %213 = vector.extract_strided_slice %178 {offsets = [0, 8], sizes = [16, 8], strides = [1, 1]} : vector<16x32xf32> to vector<16x8xf32>
    %214 = vector.shape_cast %213 : vector<16x8xf32> to vector<2x8x8xf32>
    %215 = arith.truncf %214 : vector<2x8x8xf32> to vector<2x8x8xbf16>
    "tpu.trace_start"() <{level = 10 : i32, message = "bqd,bkd->bqk"}> : () -> ()
    %cst_60 = arith.constant dense<0.000000e+00> : vector<2x8x8xf32>
    %216 = tpu.matmul %209, %212, %cst_60 {dimension_numbers = #tpu.dot_dimension_numbers<[2], [2], [1], [1], [0, 0, 0, 1, 1, 1], [0], [0]>} : vector<2x8x8xbf16>, vector<2x8x8xbf16>, vector<2x8x8xf32> -> vector<2x8x8xf32>
    "tpu.trace_stop"() : () -> ()
    %cst_61 = arith.constant 0.353553385 : f32
    %217 = vector.broadcast %cst_61 : f32 to vector<2x8x8xf32>
    %218 = arith.mulf %216, %217 : vector<2x8x8xf32>
    %cst_62 = arith.constant -1.000000e+06 : f32
    %219 = vector.broadcast %cst_62 : f32 to vector<2x8x8xf32>
    %220 = arith.select %176, %218, %219 : vector<2x8x8xi1>, vector<2x8x8xf32>
    %cst_63 = arith.constant dense<0xFF800000> : vector<2x8xf32>
    %221 = vector.multi_reduction <maximumf>, %220, %cst_63 [2] : vector<2x8x8xf32> to vector<2x8xf32>
    %222 = vector.shape_cast %221 : vector<2x8xf32> to vector<2x8x1xf32>
    %223 = vector.broadcast %222 : vector<2x8x1xf32> to vector<2x8x8xf32>
    %224 = arith.subf %220, %223 : vector<2x8x8xf32>
    %225 = math.exp %224 : vector<2x8x8xf32>
    %cst_64 = arith.constant dense<0.000000e+00> : vector<2x8xf32>
    %226 = vector.multi_reduction <add>, %225, %cst_64 [2] : vector<2x8x8xf32> to vector<2x8xf32>
    %227 = vector.shape_cast %226 : vector<2x8xf32> to vector<2x8x1xf32>
    %228 = vector.broadcast %227 : vector<2x8x1xf32> to vector<2x8x8xf32>
    %229 = arith.divf %225, %228 : vector<2x8x8xf32>
    %230 = arith.truncf %229 : vector<2x8x8xf32> to vector<2x8x8xbf16>
    "tpu.trace_start"() <{level = 10 : i32, message = "bqk,bkd->bqd"}> : () -> ()
    %cst_65 = arith.constant dense<0.000000e+00> : vector<2x8x8xf32>
    %231 = tpu.matmul %230, %215, %cst_65 {dimension_numbers = #tpu.dot_dimension_numbers<[2], [1], [1], [2], [0, 0, 0, 1, 1, 2], [0], [0]>} : vector<2x8x8xbf16>, vector<2x8x8xbf16>, vector<2x8x8xf32> -> vector<2x8x8xf32>
    "tpu.trace_stop"() : () -> ()
    %232 = vector.shape_cast %231 : vector<2x8x8xf32> to vector<16x8xf32>
    %c0_66 = arith.constant 0 : index
    %c8_67 = arith.constant 8 : index
    %233 = vector.load %arg8[%c0_66, %c8_67] : memref<16x32xf32, #tpu.memory_space<vmem>>, vector<16x8xf32>
    tpu.vector_store %arg8[%c0_66, %c8_67], %232 {strides = array<i32>} : memref<16x32xf32, #tpu.memory_space<vmem>>, vector<16x8xf32>,
    %234 = vector.extract_strided_slice %163 {offsets = [0, 16], sizes = [16, 8], strides = [1, 1]} : vector<16x32xf32> to vector<16x8xf32>
    %235 = vector.shape_cast %234 : vector<16x8xf32> to vector<2x8x8xf32>
    %236 = arith.truncf %235 : vector<2x8x8xf32> to vector<2x8x8xbf16>
    %237 = vector.extract_strided_slice %177 {offsets = [0, 16], sizes = [16, 8], strides = [1, 1]} : vector<16x32xf32> to vector<16x8xf32>
    %238 = vector.shape_cast %237 : vector<16x8xf32> to vector<2x8x8xf32>
    %239 = arith.truncf %238 : vector<2x8x8xf32> to vector<2x8x8xbf16>
    %240 = vector.extract_strided_slice %178 {offsets = [0, 16], sizes = [16, 8], strides = [1, 1]} : vector<16x32xf32> to vector<16x8xf32>
    %241 = vector.shape_cast %240 : vector<16x8xf32> to vector<2x8x8xf32>
    %242 = arith.truncf %241 : vector<2x8x8xf32> to vector<2x8x8xbf16>
    "tpu.trace_start"() <{level = 10 : i32, message = "bqd,bkd->bqk"}> : () -> ()
    %cst_68 = arith.constant dense<0.000000e+00> : vector<2x8x8xf32>
    %243 = tpu.matmul %236, %239, %cst_68 {dimension_numbers = #tpu.dot_dimension_numbers<[2], [2], [1], [1], [0, 0, 0, 1, 1, 1], [0], [0]>} : vector<2x8x8xbf16>, vector<2x8x8xbf16>, vector<2x8x8xf32> -> vector<2x8x8xf32>
    "tpu.trace_stop"() : () -> ()
    %cst_69 = arith.constant 0.353553385 : f32
    %244 = vector.broadcast %cst_69 : f32 to vector<2x8x8xf32>
    %245 = arith.mulf %243, %244 : vector<2x8x8xf32>
    %cst_70 = arith.constant -1.000000e+06 : f32
    %246 = vector.broadcast %cst_70 : f32 to vector<2x8x8xf32>
    %247 = arith.select %176, %245, %246 : vector<2x8x8xi1>, vector<2x8x8xf32>
    %cst_71 = arith.constant dense<0xFF800000> : vector<2x8xf32>
    %248 = vector.multi_reduction <maximumf>, %247, %cst_71 [2] : vector<2x8x8xf32> to vector<2x8xf32>
    %249 = vector.shape_cast %248 : vector<2x8xf32> to vector<2x8x1xf32>
    %250 = vector.broadcast %249 : vector<2x8x1xf32> to vector<2x8x8xf32>
    %251 = arith.subf %247, %250 : vector<2x8x8xf32>
    %252 = math.exp %251 : vector<2x8x8xf32>
    %cst_72 = arith.constant dense<0.000000e+00> : vector<2x8xf32>
    %253 = vector.multi_reduction <add>, %252, %cst_72 [2] : vector<2x8x8xf32> to vector<2x8xf32>
    %254 = vector.shape_cast %253 : vector<2x8xf32> to vector<2x8x1xf32>
    %255 = vector.broadcast %254 : vector<2x8x1xf32> to vector<2x8x8xf32>
    %256 = arith.divf %252, %255 : vector<2x8x8xf32>
    %257 = arith.truncf %256 : vector<2x8x8xf32> to vector<2x8x8xbf16>
    "tpu.trace_start"() <{level = 10 : i32, message = "bqk,bkd->bqd"}> : () -> ()
    %cst_73 = arith.constant dense<0.000000e+00> : vector<2x8x8xf32>
    %258 = tpu.matmul %257, %242, %cst_73 {dimension_numbers = #tpu.dot_dimension_numbers<[2], [1], [1], [2], [0, 0, 0, 1, 1, 2], [0], [0]>} : vector<2x8x8xbf16>, vector<2x8x8xbf16>, vector<2x8x8xf32> -> vector<2x8x8xf32>
    "tpu.trace_stop"() : () -> ()
    %259 = vector.shape_cast %258 : vector<2x8x8xf32> to vector<16x8xf32>
    %c0_74 = arith.constant 0 : index
    %c16_75 = arith.constant 16 : index
    %260 = vector.load %arg8[%c0_74, %c16_75] : memref<16x32xf32, #tpu.memory_space<vmem>>, vector<16x8xf32>
    tpu.vector_store %arg8[%c0_74, %c16_75], %259 {strides = array<i32>} : memref<16x32xf32, #tpu.memory_space<vmem>>, vector<16x8xf32>,
    %261 = vector.extract_strided_slice %163 {offsets = [0, 24], sizes = [16, 8], strides = [1, 1]} : vector<16x32xf32> to vector<16x8xf32>
    %262 = vector.shape_cast %261 : vector<16x8xf32> to vector<2x8x8xf32>
    %263 = arith.truncf %262 : vector<2x8x8xf32> to vector<2x8x8xbf16>
    %264 = vector.extract_strided_slice %177 {offsets = [0, 24], sizes = [16, 8], strides = [1, 1]} : vector<16x32xf32> to vector<16x8xf32>
    %265 = vector.shape_cast %264 : vector<16x8xf32> to vector<2x8x8xf32>
    %266 = arith.truncf %265 : vector<2x8x8xf32> to vector<2x8x8xbf16>
    %267 = vector.extract_strided_slice %178 {offsets = [0, 24], sizes = [16, 8], strides = [1, 1]} : vector<16x32xf32> to vector<16x8xf32>
    %268 = vector.shape_cast %267 : vector<16x8xf32> to vector<2x8x8xf32>
    %269 = arith.truncf %268 : vector<2x8x8xf32> to vector<2x8x8xbf16>
    "tpu.trace_start"() <{level = 10 : i32, message = "bqd,bkd->bqk"}> : () -> ()
    %cst_76 = arith.constant dense<0.000000e+00> : vector<2x8x8xf32>
    %270 = tpu.matmul %263, %266, %cst_76 {dimension_numbers = #tpu.dot_dimension_numbers<[2], [2], [1], [1], [0, 0, 0, 1, 1, 1], [0], [0]>} : vector<2x8x8xbf16>, vector<2x8x8xbf16>, vector<2x8x8xf32> -> vector<2x8x8xf32>
    "tpu.trace_stop"() : () -> ()
    %cst_77 = arith.constant 0.353553385 : f32
    %271 = vector.broadcast %cst_77 : f32 to vector<2x8x8xf32>
    %272 = arith.mulf %270, %271 : vector<2x8x8xf32>
    %cst_78 = arith.constant -1.000000e+06 : f32
    %273 = vector.broadcast %cst_78 : f32 to vector<2x8x8xf32>
    %274 = arith.select %176, %272, %273 : vector<2x8x8xi1>, vector<2x8x8xf32>
    %cst_79 = arith.constant dense<0xFF800000> : vector<2x8xf32>
    %275 = vector.multi_reduction <maximumf>, %274, %cst_79 [2] : vector<2x8x8xf32> to vector<2x8xf32>
    %276 = vector.shape_cast %275 : vector<2x8xf32> to vector<2x8x1xf32>
    %277 = vector.broadcast %276 : vector<2x8x1xf32> to vector<2x8x8xf32>
    %278 = arith.subf %274, %277 : vector<2x8x8xf32>
    %279 = math.exp %278 : vector<2x8x8xf32>
    %cst_80 = arith.constant dense<0.000000e+00> : vector<2x8xf32>
    %280 = vector.multi_reduction <add>, %279, %cst_80 [2] : vector<2x8x8xf32> to vector<2x8xf32>
    %281 = vector.shape_cast %280 : vector<2x8xf32> to vector<2x8x1xf32>
    %282 = vector.broadcast %281 : vector<2x8x1xf32> to vector<2x8x8xf32>
    %283 = arith.divf %279, %282 : vector<2x8x8xf32>
    %284 = arith.truncf %283 : vector<2x8x8xf32> to vector<2x8x8xbf16>
    "tpu.trace_start"() <{level = 10 : i32, message = "bqk,bkd->bqd"}> : () -> ()
    %cst_81 = arith.constant dense<0.000000e+00> : vector<2x8x8xf32>
    %285 = tpu.matmul %284, %269, %cst_81 {dimension_numbers = #tpu.dot_dimension_numbers<[2], [1], [1], [2], [0, 0, 0, 1, 1, 2], [0], [0]>} : vector<2x8x8xbf16>, vector<2x8x8xbf16>, vector<2x8x8xf32> -> vector<2x8x8xf32>
    "tpu.trace_stop"() : () -> ()
    %286 = vector.shape_cast %285 : vector<2x8x8xf32> to vector<16x8xf32>
    %c0_82 = arith.constant 0 : index
    %c24_83 = arith.constant 24 : index
    %287 = vector.load %arg8[%c0_82, %c24_83] : memref<16x32xf32, #tpu.memory_space<vmem>>, vector<16x8xf32>
    tpu.vector_store %arg8[%c0_82, %c24_83], %286 {strides = array<i32>} : memref<16x32xf32, #tpu.memory_space<vmem>>, vector<16x8xf32>,
    %c0_84 = arith.constant 0 : index
    %c0_85 = arith.constant 0 : index
    %288 = vector.load %arg8[%c0_84, %c0_85] : memref<16x32xf32, #tpu.memory_space<vmem>>, vector<16x32xf32>
    %289 = arith.truncf %288 : vector<16x32xf32> to vector<16x32xbf16>
    %cst_86 = arith.constant dense<0.000000e+00> : vector<16x32xf32>
    %290 = tpu.matmul %289, %179, %cst_86 {dimension_numbers = #tpu.dot_dimension_numbers<[1], [0], [0], [1], [0, 0, 1, 1], [], []>} : vector<16x32xbf16>, vector<32x32xbf16>, vector<16x32xf32> -> vector<16x32xf32>
    %291 = arith.addf %290, %160 : vector<16x32xf32>
    %cst_87 = arith.constant dense<0.000000e+00> : vector<16xf32>
    %292 = vector.multi_reduction <add>, %291, %cst_87 [1] : vector<16x32xf32> to vector<16xf32>
    %293 = vector.shape_cast %292 : vector<16xf32> to vector<16x1xf32>
    %cst_88 = arith.constant 3.200000e+01 : f32
    %294 = vector.broadcast %cst_88 : f32 to vector<16x1xf32>
    %295 = arith.divf %293, %294 : vector<16x1xf32>
    %296 = vector.broadcast %295 : vector<16x1xf32> to vector<16x32xf32>
    %297 = arith.subf %291, %296 : vector<16x32xf32>
    %298 = arith.mulf %297, %297 : vector<16x32xf32>
    %cst_89 = arith.constant dense<0.000000e+00> : vector<16xf32>
    %299 = vector.multi_reduction <add>, %298, %cst_89 [1] : vector<16x32xf32> to vector<16xf32>
    %300 = vector.shape_cast %299 : vector<16xf32> to vector<16x1xf32>
    %cst_90 = arith.constant 3.200000e+01 : f32
    %301 = vector.broadcast %cst_90 : f32 to vector<16x1xf32>
    %302 = arith.divf %300, %301 : vector<16x1xf32>
    %cst_91 = arith.constant 9.99999974E-6 : f32
    %303 = vector.broadcast %cst_91 : f32 to vector<16x1xf32>
    %304 = arith.addf %302, %303 : vector<16x1xf32>
    %305 = math.rsqrt %304 : vector<16x1xf32>
    %306 = vector.broadcast %305 : vector<16x1xf32> to vector<16x32xf32>
    %307 = arith.mulf %297, %306 : vector<16x32xf32>
    %308 = vector.broadcast %7 : vector<1x32xf32> to vector<16x32xf32>
    %309 = arith.mulf %307, %308 : vector<16x32xf32>
    %310 = vector.broadcast %8 : vector<1x32xf32> to vector<16x32xf32>
    %311 = arith.addf %309, %310 : vector<16x32xf32>
    %312 = vector.extract_strided_slice %13 {offsets = [0, 96], sizes = [16, 64], strides = [1, 1]} : vector<16x160xf32> to vector<16x64xf32>
    %313 = vector.broadcast %3 : vector<1x64xf32> to vector<16x64xf32>
    %314 = arith.addf %312, %313 : vector<16x64xf32>
    %cst_92 = arith.constant 0.000000e+00 : f32
    %315 = vector.broadcast %cst_92 : f32 to vector<16x64xf32>
    %316 = arith.maximumf %314, %315 : vector<16x64xf32>
    %317 = arith.truncf %316 : vector<16x64xf32> to vector<16x64xbf16>
    %c0_93 = arith.constant 0 : index
    %c0_94 = arith.constant 0 : index
    %318 = vector.load %arg5[%c0_93, %c0_94] : memref<64x32xbf16, #tpu.memory_space<vmem>>, vector<64x32xbf16>
    %cst_95 = arith.constant dense<0.000000e+00> : vector<16x32xf32>
    %319 = tpu.matmul %317, %318, %cst_95 {dimension_numbers = #tpu.dot_dimension_numbers<[1], [0], [0], [1], [0, 0, 1, 1], [], []>} : vector<16x64xbf16>, vector<64x32xbf16>, vector<16x32xf32> -> vector<16x32xf32>
    %320 = vector.broadcast %4 : vector<1x32xf32> to vector<16x32xf32>
    %321 = arith.addf %319, %320 : vector<16x32xf32>
    %322 = arith.addf %321, %311 : vector<16x32xf32>
    %cst_96 = arith.constant dense<0.000000e+00> : vector<16xf32>
    %323 = vector.multi_reduction <add>, %322, %cst_96 [1] : vector<16x32xf32> to vector<16xf32>
    %324 = vector.shape_cast %323 : vector<16xf32> to vector<16x1xf32>
    %cst_97 = arith.constant 3.200000e+01 : f32
    %325 = vector.broadcast %cst_97 : f32 to vector<16x1xf32>
    %326 = arith.divf %324, %325 : vector<16x1xf32>
    %327 = vector.broadcast %326 : vector<16x1xf32> to vector<16x32xf32>
    %328 = arith.subf %322, %327 : vector<16x32xf32>
    %329 = arith.mulf %328, %328 : vector<16x32xf32>
    %cst_98 = arith.constant dense<0.000000e+00> : vector<16xf32>
    %330 = vector.multi_reduction <add>, %329, %cst_98 [1] : vector<16x32xf32> to vector<16xf32>
    %331 = vector.shape_cast %330 : vector<16xf32> to vector<16x1xf32>
    %cst_99 = arith.constant 3.200000e+01 : f32
    %332 = vector.broadcast %cst_99 : f32 to vector<16x1xf32>
    %333 = arith.divf %331, %332 : vector<16x1xf32>
    %cst_100 = arith.constant 9.99999974E-6 : f32
    %334 = vector.broadcast %cst_100 : f32 to vector<16x1xf32>
    %335 = arith.addf %333, %334 : vector<16x1xf32>
    %336 = math.rsqrt %335 : vector<16x1xf32>
    %337 = vector.broadcast %336 : vector<16x1xf32> to vector<16x32xf32>
    %338 = arith.mulf %328, %337 : vector<16x32xf32>
    %339 = vector.broadcast %9 : vector<1x32xf32> to vector<16x32xf32>
    %340 = arith.mulf %338, %339 : vector<16x32xf32>
    %341 = vector.broadcast %10 : vector<1x32xf32> to vector<16x32xf32>
    %342 = arith.addf %340, %341 : vector<16x32xf32>
    %c0_101 = arith.constant 0 : index
    %c0_102 = arith.constant 0 : index
    %343 = vector.load %arg7[%c0_101, %c0_102] : memref<16x32xf32, #tpu.memory_space<vmem>>, vector<16x32xf32>
    tpu.vector_store %arg7[%c0_101, %c0_102], %342 {strides = array<i32>} : memref<16x32xf32, #tpu.memory_space<vmem>>, vector<16x32xf32>,
    return
  }
}

</mosaic_0001>

<bundles_post_ra>
// kernel: transformer_decoder_block.1
= control target key start
LH: loop header
LB: loop body
LE: loop exit
PB: predicated region body
PF: predicated region fallthrough
CT: control target
= control target key end

     0   :  { %12 = vsyncpa [#allocation4], 0  ;;  %s3668_s0 = inlined_call_operand.vmem [shape: f32[16,32], index: 0, kind: input, shape index: {}]   ;;  %s3669_s1 = inlined_call_operand.hbm [shape: f32[16,32], index: 1, kind: input, shape index: {}]   ;;  %s3670_s2 = inlined_call_operand.vmem [shape: s32[2], index: 2, kind: input, shape index: {}]   ;;  %s3671_s3 = inlined_call_operand.vmem [shape: bf16[32,160], index: 3, kind: input, shape index: {}]   ;;  %s3672_s4 = inlined_call_operand.hbm [shape: bf16[32,160], index: 4, kind: input, shape index: {}]   ;;  %s3673_s5 = inlined_call_operand.vmem [shape: bf16[64,32], index: 5, kind: input, shape index: {}]   ;;  %s3674_s6 = inlined_call_operand.vmem [shape: f32[8,64], index: 6, kind: input, shape index: {}]   ;;  %s3675_s7 = inlined_call_operand.hbm [shape: f32[16,32], index: 7, kind: output, shape index: {}]  }
   0x1   :  { %13 = vsyncpa [#allocation6], 0 }
   0x2   :  { %14 = vsyncpa [#allocation9], 0 }
   0x3   :  { %15 = vsyncpa [#allocation5], 0  ;;  %s3072_s24 = smov [#allocation3]   ;;  %s36_s28 = sshll.u32 %s3670_s2, 4  ;;  %s37_s28 = int_to_ptr.vmem [resolvable:$true] %s36_s28 }
   0x4   :  { %s23_s25 = sshll.u32 %s3072_s24, 4  ;;  %s24_s25 = int_to_ptr.vmem [resolvable:$true] %s23_s25 }
   0x5   :  { %s3000_s29 = scalar_lea.vmem %s24_s25, 256  ;;  %p3005_p1 = scmp.lt.s32.totalorder %s24_s25, %s24_s25 }
   0x6   :  { %p3001_p0 = scmp.ne.s32.totalorder %s24_s25, %s3000_s29  ;;  %p3006_p2 = scmp.lt.s32.totalorder %s3000_s29, %s3000_s29 }
   0x8   :  { %p3007_p3 = por %p3006_p2, %p3005_p1 }
   0xa   :  { %p3008_p4 = pnand %p3007_p3, %p3001_p0 }
   0xc   :  { %3011 = shalt.err (!%p3008_p4)
}
   0xd   :  { %s3073_s30 = smov 128   ;;  %s3074_s8 = smov 8  }
   0xe   :  { %29 = dma.hbm_to_vmem [thread:$0]  %s3669_s1, 256, %s24_s25, [#allocation4], %s3073_s30, %s3073_s30, %s3074_s8  }
   0xf   :  { %s3012_s11 = scalar_lea.vmem %s37_s28, 16  ;;  %p3017_p6 = scmp.lt.s32.totalorder %s37_s28, %s37_s28 }
  0x10   :  { %p3013_p5 = scmp.ne.s32.totalorder %s37_s28, %s3012_s11  ;;  %p3018_p7 = scmp.lt.s32.totalorder %s3012_s11, %s3012_s11 }
  0x12   :  { %p3019_p8 = por %p3018_p7, %p3017_p6 }
  0x14   :  { %p3020_p9 = pnand %p3019_p8, %p3013_p5 }
  0x16   :  { %3023 = shalt.err (!%p3020_p9)
}
  0x17   :  { %s3075_s2 = smov [#allocation7]   ;;  %s3076_s12 = smov [#allocation8]  }
  0x18   :  { %39 = dma.vmem_to_smem %s37_s28, 16, %s3075_s2, [#allocation6]  }
  0x19   :  { %s47_s13 = sshll.u32 %s3076_s12, 4  ;;  %s48_s13 = int_to_ptr.vmem [resolvable:$true] %s47_s13 }
  0x1a   :  { %s3032_s14 = scalar_lea.vmem %s48_s13, 512  ;;  %p3037_p11 = scmp.lt.s32.totalorder %s48_s13, %s48_s13 }
  0x1b   :  { %p3033_p10 = scmp.ne.s32.totalorder %s48_s13, %s3032_s14  ;;  %p3038_p12 = scmp.lt.s32.totalorder %s3032_s14, %s3032_s14 }
  0x1d   :  { %p3039_p13 = por %p3038_p12, %p3037_p11 }
  0x1f   :  { %p3040_p0 = pnand %p3039_p13, %p3033_p10 }
  0x21   :  { %3043 = shalt.err (!%p3040_p0)
}
  0x22   :  { %53 = dma.hbm_to_vmem [thread:$0]  %s3672_s4, 512, %s48_s13, [#allocation9], %s3073_s30, %s3073_s30, %s3074_s8  }
  0x23   :  { %3064 = dma.done.wait [#allocation4], 256  }
  0x24   :  { %3065 = vsyncadd [#allocation4], 4294967040 }
  0x25   :  { %3066 = dma.done.wait [#allocation6], 16  }
  0x26   :  { %3067 = vsyncadd [#allocation6], 4294967280 }
  0x27   :  { %3068 = dma.done.wait [#allocation9], 512  }
  0x28   :  { %3069 = vsyncadd [#allocation9], 4294966784 }
  0x29   :  { %67 = sfence }
  0x2a   :  { %v2900_v0 = vld [vmem:[%s3671_s3 + $0x14] ss:$8 sps:$4 sm:$0xff]   ;;  %v2902_v1 = vld [vmem:[%s3671_s3 + $0x10] ss:$8 sps:$4 sm:$0xff]   ;;  %v3077_v2 = vmov 0   ;;  %v3165_v5 = vld [vmem:[%s3668_s0] sm:$0xff]  ;;  %v146_v18 = vlaneseq }
  0x2b   :  { %135 = vmatprep.mubr.bf16.mxu0 %v3077_v2  ;;  %115 = vmatprep.subr.bf16.mxu0 %v2900_v0  ;;  %v2903_v3 = vld [vmem:[%s3671_s3 + $0x4] ss:$8 sps:$4 sm:$0xff]   ;;  %v2905_v4 = vld [vmem:[%s3671_s3] ss:$8 sps:$4 sm:$0xff]   ;;  %vm99_vm0 = vcmask 261120   ;;  %v3078_v8 = vmov 0.0  }
  0x2c   :  { %116 = vmatpush1.bf16.msra.mxu0 %v2902_v1  ;;  %v3170_v6 = vld [vmem:[%s3668_s0 + $0x8] sm:$0xff]  ;;  %2641 = vmatprep.subr.bf16.mxu1 %v3078_v8  ;;  %vm3079_vm1 = vmmov 0   ;;  %s3080_s0 = smov 96   ;;  %vm160_vm2 = vcmask 64512   ;;  %v3211_v19 = vshrl.u32 %v146_v18, 7  ;;  %v3213_v20 = vand.u32 127, %v146_v18 }
  0x2d   :  { %117 = vmatprep.subr.bf16.mxu0 %v2903_v3  ;;  %v74_v7 = vpack.c.bf16 %v3170_v6, %v3165_v5  ;;  %2643 = vmatprep.mubr.msk.bf16.mxu1 %vm3079_vm1, %v3078_v8  ;;  %s3081_s3 = smov 64   ;;  %s3082_s27 = smov 88   ;;  %vm291_vm4 = vcmask 1043456   ;;  %vm617_vm5 = vcmask 130112   ;;  %vm852_vm6 = vcmask 195712  }
  0x2e   :  { %vm3217_vm3 = vcmp.le.s32.totalorder %v3213_v20, %v3211_v19  ;;  %s3083_s28 = smov 120   ;;  %s3084_s29 = smov 56   ;;  %vm1087_vm7 = vcmask 261312   ;;  %vm2401_vm10 = vcmask 523264  }
  0x2f   :  { %s3085_s9 = smov 80   ;;  %s3086_s10 = smov 112  }
  0x30   :  { %118 = vmatpush1.bf16.msra.mxu0 %v2905_v4  ;;  %s3087_s11 = smov 48   ;;  %s3088_s2 = smov 72  }
  0x31   :  { %2647 = vmatprep.subr.bf16.mxu0 %v3078_v8  ;;  %s3089_s12 = smov 104   ;;  %s3090_s13 = smov 40  }
  0x32   :  { %s3091_s14 = smov 16   ;;  %s3092_s1 = smov 24  }
  0x33   :  { %2511 = vmatmul.mubr.msk.bf16.vlgmr.msra.gmra.mxu0 %vm99_vm0, %v74_v7  ;;  %s2535_s17 = sld [smem:[#allocation7 + $0x1]]  ;;  %s3094_s25 = smov [#allocation10]  }
  0x34   :  { %2649 = vmatprep.mubr.msk.bf16.mxu0 %vm3079_vm1, %v3078_v8  ;;  %s2493_s26 = sshll.u32 %s3094_s25, 4  ;;  %s2494_s26 = int_to_ptr.vmem [resolvable:$true] %s2493_s26 }
  0x35   :  { %p3049_p2 = scmp.lt.s32.totalorder %s2494_s26, %s2494_s26 }
  0xf3   :  { %v3181_v9 = vpop.f32.mrf.mxu0 }
  0xf4   :  { %v3185_v10 = vpack.c.bf16 %v3181_v9, %v3181_v9 }
  0xf5   :  { %v3187_v11 = vpop.f32.mrf.mxu0 }
  0xf6   :  { %158 = vrot.lane.b32.xlu0 %v3185_v10, %s3080_s0 }
  0xf7   :  { %v3191_v12 = vpop.f32.mrf.mxu0 }
  0xf8   :  { %v3195_v13 = vpack.c.bf16 %v3191_v12, %v3191_v12 }
  0xf9   :  { %v3221_v24 = vpop.f32.mrf.mxu0 }
  0xfa   :  { %208 = vrot.lane.b32.xlu0 %v3195_v13, %s3080_s0 }
 0x168   :  { %v159_v14 = vpop.permute.xlu0 %158 }
 0x169   :  { %v165_v15 = vsel %vm160_vm2, %v159_v14, 0 }
 0x16a   :  { %2642 = vmatpush3.bf16.xpose.msra.mxu1 %v165_v15 }
 0x16b   :  { %2653 = vmatprep.subr.bf16.mxu1 %v3078_v8 }
 0x16c   :  { %v209_v16 = vpop.permute.xlu0 %208 }
 0x16d   :  { %v214_v17 = vsel %vm160_vm2, %v209_v16, 0 }
 0x16e   :  { %2648 = vmatpush3.bf16.xpose.msra.mxu0 %v214_v17 }
 0x16f   :  { %2659 = vmatprep.subr.bf16.mxu0 %v3078_v8 }
 0x171   :  { %2644 = vmatmul.mubr.msk.bf16.vlgmr.msra.gmra.mxu1 %vm160_vm2, %v3185_v10 }
 0x172   :  { %2655 = vmatprep.mubr.msk.bf16.mxu1 %vm3079_vm1, %v3078_v8 }
 0x175   :  { %2650 = vmatmul.mubr.msk.bf16.vlgmr.msra.gmra.mxu0 %vm160_vm2, %v3195_v13 }
 0x176   :  { %2661 = vmatprep.mubr.msk.bf16.mxu0 %vm3079_vm1, %v3078_v8 }
 0x231   :  { %v201_v21 = vpop.f32.mrf.mxu1 }
 0x232   :  { %v256_v23 = vmul.f32 0.35355338, %v201_v21 }
 0x233   :  { %v2645_v25 = vpop.f32.mrf.mxu1 }
 0x234   :  { %v260_v26 = vsel %vm3217_vm3, %v256_v23, -1000000.0 }
 0x235   :  { %v204_v27 = vpop.f32.mrf.mxu1  ;;  %v250_v28 = vpop.f32.mrf.mxu0  ;;  %v262_v29 = vsel %vm160_vm2, %v260_v26, -inf }
 0x236   :  { %v257_v30 = vmul.f32 0.35355338, %v250_v28  ;;  %263 = vmax.xlane.f32.xlu1 %v262_v29 }
 0x237   :  { %v2646_v31 = vpop.f32.mrf.mxu1  ;;  %v2651_v32 = vpop.f32.mrf.mxu0 }
 0x238   :  { %v261_v33 = vsel %vm3217_vm3, %v257_v30, -1000000.0 }
 0x239   :  { %v253_v34 = vpop.f32.mrf.mxu0  ;;  %v265_v35 = vsel %vm160_vm2, %v261_v33, -inf }
 0x23a   :  { %266 = vmax.xlane.f32.xlu1 %v265_v35 }
 0x23b   :  { %v2652_v36 = vpop.f32.mrf.mxu0 }
 0x24b   :  { %286 = vrot.lane.b32.xlu1 %v3185_v10, %s3081_s3 }
 0x24f   :  { %335 = vrot.lane.b32.xlu1 %v3195_v13, %s3081_s3 }
 0x253   :  { %387 = vrot.lane.b32.xlu1 %v3185_v10, %s3082_s27 }
 0x2bf   :  { %v264_v37 = vpop.xlane.xlu1 %263 }
 0x2c0   :  { %v268_v38 = vsub.f32 %v260_v26, %v264_v37 }
 0x2c2   :  { %v270_v39 = vmul.f32 1.442695, %v268_v38 }
 0x2c3   :  { %v267_v40 = vpop.xlane.xlu1 %266 }
 0x2c4   :  { %2916 = vpow2.f32 %v270_v39  ;;  %v269_v41 = vsub.f32 %v261_v33, %v267_v40 }
 0x2c6   :  { %v272_v42 = vmul.f32 1.442695, %v269_v41 }
 0x2c7   :  { %v287_v43 = vpop.permute.xlu1 %286 }
 0x2c8   :  { %2918 = vpow2.f32 %v272_v42  ;;  %v293_v44 = vsel %vm291_vm4, %v287_v43, 0 }
 0x2c9   :  { %2654 = vmatpush3.bf16.msra.mxu1 %v293_v44 }
 0x2ca   :  { %2665 = vmatprep.subr.bf16.mxu1 %v3078_v8 }
 0x2cb   :  { %v336_v45 = vpop.permute.xlu1 %335 }
 0x2cc   :  { %v341_v46 = vsel %vm291_vm4, %v336_v45, 0 }
 0x2cd   :  { %2660 = vmatpush3.bf16.msra.mxu0 %v341_v46 }
 0x2ce   :  { %2671 = vmatprep.subr.bf16.mxu0 %v3078_v8 }
 0x2cf   :  { %v388_v51 = vpop.permute.xlu1 %387 }
 0x2d0   :  { %v393_v58 = vsel %vm160_vm2, %v388_v51, 0 }
 0x2d1   :  { %v2917_v47 = vpop.eup %2916 }
 0x2d2   :  { %v274_v48 = vsel %vm160_vm2, %v2917_v47, 0.0 }
 0x2d3   :  { %275 = vadd.xlane.f32.xlu0 %v274_v48 }
 0x2d5   :  { %v2919_v49 = vpop.eup %2918 }
 0x2d6   :  { %v277_v50 = vsel %vm160_vm2, %v2919_v49, 0.0 }
 0x2d7   :  { %278 = vadd.xlane.f32.xlu1 %v277_v50 }
 0x2e8   :  { %437 = vrot.lane.b32.xlu1 %v3195_v13, %s3082_s27 }
 0x2e9   :  { %385 = vrot.lane.b32.xlu0 %v3185_v10, %s3083_s28 }
 0x2ec   :  { %435 = vrot.lane.b32.xlu1 %v3195_v13, %s3083_s28 }
 0x35c   :  { %v276_v52 = vpop.xlane.xlu0 %275 }
 0x35d   :  { %2920 = vrcp.f32 %v276_v52 }
 0x360   :  { %v279_v53 = vpop.xlane.xlu1 %278  ;;  %v386_v63 = vpop.permute.xlu0 %385 }
 0x361   :  { %2922 = vrcp.f32 %v279_v53 }
 0x364   :  { %v438_v60 = vpop.permute.xlu1 %437 }
 0x365   :  { %v443_v62 = vsel %vm160_vm2, %v438_v60, 0 }
 0x368   :  { %v436_v0 = vpop.permute.xlu1 %435 }
 0x36a   :  { %v2921_v54 = vpop.eup %2920 }
 0x36b   :  { %v281_v55 = vmul.f32 %v2921_v54, %v2917_v47 }
 0x36d   :  { %v284_v56 = vpack.c.bf16 %v281_v55, %v281_v55 }
 0x36e   :  { %v2923_v57 = vpop.eup %2922 }
 0x36f   :  { %2656 = vmatmul.mubr.msk.bf16.vlgmr.msra.gmra.mxu1 %vm160_vm2, %v284_v56  ;;  %v283_v59 = vmul.f32 %v2923_v57, %v2919_v49 }
 0x370   :  { %2666 = vmatpush3.bf16.xpose.msra.mxu1 %v393_v58  ;;  %2667 = vmatprep.mubr.msk.bf16.mxu1 %vm3079_vm1, %v3078_v8 }
 0x371   :  { %v285_v61 = vpack.c.bf16 %v283_v59, %v283_v59  ;;  %2677 = vmatprep.subr.bf16.mxu1 %v3078_v8 }
 0x373   :  { %2662 = vmatmul.mubr.msk.bf16.vlgmr.msra.gmra.mxu0 %vm160_vm2, %v285_v61 }
 0x374   :  { %2672 = vmatpush3.bf16.xpose.msra.mxu0 %v443_v62  ;;  %2673 = vmatprep.mubr.msk.bf16.mxu0 %vm3079_vm1, %v3078_v8 }
 0x375   :  { %2683 = vmatprep.subr.bf16.mxu0 %v3078_v8 }
 0x377   :  { %2668 = vmatmul.mubr.msk.bf16.vlgmr.msra.gmra.mxu1 %vm160_vm2, %v386_v63 }
 0x378   :  { %2679 = vmatprep.mubr.msk.bf16.mxu1 %vm3079_vm1, %v3078_v8 }
 0x37b   :  { %2674 = vmatmul.mubr.msk.bf16.vlgmr.msra.gmra.mxu0 %vm160_vm2, %v436_v0 }
 0x37c   :  { %2685 = vmatprep.mubr.msk.bf16.mxu0 %vm3079_vm1, %v3078_v8 }
 0x42f   :  { %v329_v1 = vpop.f32.mrf.mxu1 }
 0x430   :  { %383 = vst.msk [vmem:[#allocation2] sm:$0xff] %vm160_vm2, %v329_v1 }
 0x431   :  { %v2657_v2 = vpop.f32.mrf.mxu1 }
 0x433   :  { %v332_v3 = vpop.f32.mrf.mxu1  ;;  %v377_v4 = vpop.f32.mrf.mxu0 }
 0x434   :  { %384 = vst.msk [vmem:[#allocation2 + $0x8] sm:$0xff] %vm160_vm2, %v377_v4 }
 0x435   :  { %v2658_v7 = vpop.f32.mrf.mxu1  ;;  %v2663_v14 = vpop.f32.mrf.mxu0 }
 0x437   :  { %v380_v15 = vpop.f32.mrf.mxu0  ;;  %v429_v16 = vpop.f32.mrf.mxu1 }
 0x438   :  { %v485_v17 = vmul.f32 0.35355338, %v429_v16 }
 0x439   :  { %v2664_v18 = vpop.f32.mrf.mxu0  ;;  %v2669_v21 = vpop.f32.mrf.mxu1 }
 0x43a   :  { %v487_v23 = vsel %vm3217_vm3, %v485_v17, -1000000.0 }
 0x43b   :  { %v432_v25 = vpop.f32.mrf.mxu1  ;;  %v479_v26 = vpop.f32.mrf.mxu0  ;;  %v489_v27 = vsel %vm160_vm2, %v487_v23, -inf }
 0x43c   :  { %v486_v28 = vmul.f32 0.35355338, %v479_v26  ;;  %490 = vmax.xlane.f32.xlu1 %v489_v27 }
 0x43d   :  { %v2670_v29 = vpop.f32.mrf.mxu1  ;;  %v2675_v30 = vpop.f32.mrf.mxu0 }
 0x43e   :  { %v488_v31 = vsel %vm3217_vm3, %v486_v28, -1000000.0 }
 0x43f   :  { %v482_v32 = vpop.f32.mrf.mxu0  ;;  %v492_v33 = vsel %vm160_vm2, %v488_v31, -inf }
 0x440   :  { %493 = vmax.xlane.f32.xlu0 %v492_v33 }
 0x441   :  { %v2676_v34 = vpop.f32.mrf.mxu0 }
 0x44d   :  { %513 = vrot.lane.b32.xlu1 %v3185_v10, %s3084_s29 }
 0x451   :  { %622 = vrot.lane.b32.xlu1 %v3185_v10, %s3085_s9 }
 0x456   :  { %561 = vrot.lane.b32.xlu0 %v3195_v13, %s3084_s29 }
 0x45a   :  { %620 = vrot.lane.b32.xlu0 %v3185_v10, %s3086_s10 }
 0x4c5   :  { %v491_v35 = vpop.xlane.xlu1 %490 }
 0x4c6   :  { %v495_v36 = vsub.f32 %v487_v23, %v491_v35 }
 0x4c8   :  { %v497_v37 = vmul.f32 1.442695, %v495_v36 }
 0x4c9   :  { %v514_v38 = vpop.permute.xlu1 %513  ;;  %v494_v39 = vpop.xlane.xlu0 %493 }
 0x4ca   :  { %2924 = vpow2.f32 %v497_v37  ;;  %v519_v40 = vsel %vm291_vm4, %v514_v38, 0  ;;  %v496_v41 = vsub.f32 %v488_v31, %v494_v39 }
 0x4cb   :  { %2678 = vmatpush3.bf16.msra.mxu1 %v519_v40 }
 0x4cc   :  { %v499_v42 = vmul.f32 1.442695, %v496_v41  ;;  %2689 = vmatprep.subr.bf16.mxu1 %v3078_v8 }
 0x4cd   :  { %v562_v43 = vpop.permute.xlu0 %561  ;;  %v623_v49 = vpop.permute.xlu1 %622 }
 0x4ce   :  { %2926 = vpow2.f32 %v499_v42  ;;  %v567_v44 = vsel %vm291_vm4, %v562_v43, 0  ;;  %v628_v56 = vsel %vm160_vm2, %v623_v49, 0 }
 0x4cf   :  { %2684 = vmatpush3.bf16.msra.mxu0 %v567_v44 }
 0x4d0   :  { %2695 = vmatprep.subr.bf16.mxu0 %v3078_v8 }
 0x4d1   :  { %v621_v61 = vpop.permute.xlu0 %620 }
 0x4d7   :  { %v2925_v45 = vpop.eup %2924 }
 0x4d8   :  { %v501_v46 = vsel %vm160_vm2, %v2925_v45, 0.0 }
 0x4d9   :  { %502 = vadd.xlane.f32.xlu1 %v501_v46 }
 0x4db   :  { %v2927_v47 = vpop.eup %2926 }
 0x4dc   :  { %v504_v48 = vsel %vm160_vm2, %v2927_v47, 0.0 }
 0x4dd   :  { %505 = vadd.xlane.f32.xlu1 %v504_v48 }
 0x4ee   :  { %672 = vrot.lane.b32.xlu1 %v3195_v13, %s3085_s9 }
 0x4f2   :  { %670 = vrot.lane.b32.xlu1 %v3195_v13, %s3086_s10 }
 0x562   :  { %v503_v50 = vpop.xlane.xlu1 %502 }
 0x563   :  { %2928 = vrcp.f32 %v503_v50 }
 0x566   :  { %v506_v51 = vpop.xlane.xlu1 %505 }
 0x567   :  { %2930 = vrcp.f32 %v506_v51 }
 0x56a   :  { %v673_v58 = vpop.permute.xlu1 %672 }
 0x56b   :  { %v678_v60 = vsel %vm160_vm2, %v673_v58, 0 }
 0x56e   :  { %v671_v62 = vpop.permute.xlu1 %670 }
 0x570   :  { %v2929_v52 = vpop.eup %2928 }
 0x571   :  { %v508_v53 = vmul.f32 %v2929_v52, %v2925_v45 }
 0x573   :  { %v511_v54 = vpack.c.bf16 %v508_v53, %v508_v53 }
 0x574   :  { %v2931_v55 = vpop.eup %2930 }
 0x575   :  { %2680 = vmatmul.mubr.msk.bf16.vlgmr.msra.gmra.mxu1 %vm160_vm2, %v511_v54  ;;  %v510_v57 = vmul.f32 %v2931_v55, %v2927_v47 }
 0x576   :  { %2690 = vmatpush3.bf16.xpose.msra.mxu1 %v628_v56  ;;  %2691 = vmatprep.mubr.msk.bf16.mxu1 %vm3079_vm1, %v3078_v8 }
 0x577   :  { %v512_v59 = vpack.c.bf16 %v510_v57, %v510_v57  ;;  %2701 = vmatprep.subr.bf16.mxu1 %v3078_v8 }
 0x579   :  { %2686 = vmatmul.mubr.msk.bf16.vlgmr.msra.gmra.mxu0 %vm160_vm2, %v512_v59 }
 0x57a   :  { %2696 = vmatpush3.bf16.xpose.msra.mxu0 %v678_v60  ;;  %2697 = vmatprep.mubr.msk.bf16.mxu0 %vm3079_vm1, %v3078_v8 }
 0x57b   :  { %2707 = vmatprep.subr.bf16.mxu0 %v3078_v8 }
 0x57d   :  { %2692 = vmatmul.mubr.msk.bf16.vlgmr.msra.gmra.mxu1 %vm160_vm2, %v621_v61 }
 0x57e   :  { %2703 = vmatprep.mubr.msk.bf16.mxu1 %vm3079_vm1, %v3078_v8 }
 0x581   :  { %2698 = vmatmul.mubr.msk.bf16.vlgmr.msra.gmra.mxu0 %vm160_vm2, %v671_v62 }
 0x582   :  { %2709 = vmatprep.mubr.msk.bf16.mxu0 %vm3079_vm1, %v3078_v8 }
 0x635   :  { %v3303_v63 = vpop.f32.mrf.mxu1 }
 0x637   :  { %v2681_v0 = vpop.f32.mrf.mxu1 }
 0x639   :  { %v558_v1 = vpop.f32.mrf.mxu1  ;;  %v3305_v2 = vpop.f32.mrf.mxu0 }
 0x63b   :  { %v2682_v3 = vpop.f32.mrf.mxu1  ;;  %v2687_v4 = vpop.f32.mrf.mxu0 }
 0x63d   :  { %v606_v7 = vpop.f32.mrf.mxu0  ;;  %v664_v14 = vpop.f32.mrf.mxu1 }
 0x63e   :  { %v720_v15 = vmul.f32 0.35355338, %v664_v14 }
 0x63f   :  { %v2688_v16 = vpop.f32.mrf.mxu0  ;;  %v2693_v17 = vpop.f32.mrf.mxu1 }
 0x640   :  { %v722_v18 = vsel %vm3217_vm3, %v720_v15, -1000000.0 }
 0x641   :  { %v667_v21 = vpop.f32.mrf.mxu1  ;;  %v714_v23 = vpop.f32.mrf.mxu0  ;;  %v724_v25 = vsel %vm160_vm2, %v722_v18, -inf }
 0x642   :  { %v721_v26 = vmul.f32 0.35355338, %v714_v23  ;;  %725 = vmax.xlane.f32.xlu0 %v724_v25 }
 0x643   :  { %v2694_v27 = vpop.f32.mrf.mxu1  ;;  %v2699_v28 = vpop.f32.mrf.mxu0 }
 0x644   :  { %v723_v29 = vsel %vm3217_vm3, %v721_v26, -1000000.0 }
 0x645   :  { %v717_v30 = vpop.f32.mrf.mxu0  ;;  %v727_v31 = vsel %vm160_vm2, %v723_v29, -inf }
 0x646   :  { %728 = vmax.xlane.f32.xlu1 %v727_v31 }
 0x647   :  { %v2700_v32 = vpop.f32.mrf.mxu0 }
 0x657   :  { %748 = vrot.lane.b32.xlu1 %v3185_v10, %s3087_s11 }
 0x65b   :  { %857 = vrot.lane.b32.xlu1 %v3185_v10, %s3088_s2 }
 0x65f   :  { %907 = vrot.lane.b32.xlu1 %v3195_v13, %s3088_s2 }
 0x663   :  { %905 = vrot.lane.b32.xlu1 %v3195_v13, %s3089_s12 }
 0x6cb   :  { %v726_v33 = vpop.xlane.xlu0 %725 }
 0x6cc   :  { %v730_v34 = vsub.f32 %v722_v18, %v726_v33 }
 0x6ce   :  { %v732_v35 = vmul.f32 1.442695, %v730_v34 }
 0x6cf   :  { %v729_v36 = vpop.xlane.xlu1 %728 }
 0x6d0   :  { %2932 = vpow2.f32 %v732_v35  ;;  %v731_v37 = vsub.f32 %v723_v29, %v729_v36 }
 0x6d2   :  { %v734_v38 = vmul.f32 1.442695, %v731_v37 }
 0x6d3   :  { %v749_v39 = vpop.permute.xlu1 %748 }
 0x6d4   :  { %2934 = vpow2.f32 %v734_v38  ;;  %v754_v40 = vsel %vm291_vm4, %v749_v39, 0 }
 0x6d5   :  { %2702 = vmatpush3.bf16.msra.mxu1 %v754_v40 }
 0x6d6   :  { %2713 = vmatprep.subr.bf16.mxu1 %v3078_v8 }
 0x6d7   :  { %v858_v50 = vpop.permute.xlu1 %857 }
 0x6d8   :  { %v863_v54 = vsel %vm160_vm2, %v858_v50, 0 }
 0x6db   :  { %v908_v56 = vpop.permute.xlu1 %907 }
 0x6dc   :  { %v913_v58 = vsel %vm160_vm2, %v908_v56, 0 }
 0x6dd   :  { %v2933_v41 = vpop.eup %2932 }
 0x6de   :  { %v736_v42 = vsel %vm160_vm2, %v2933_v41, 0.0 }
 0x6df   :  { %737 = vadd.xlane.f32.xlu0 %v736_v42  ;;  %v906_v60 = vpop.permute.xlu1 %905 }
 0x6e1   :  { %v2935_v43 = vpop.eup %2934 }
 0x6e2   :  { %v739_v44 = vsel %vm160_vm2, %v2935_v43, 0.0 }
 0x6e3   :  { %740 = vadd.xlane.f32.xlu0 %v739_v44 }
 0x6f9   :  { %796 = vrot.lane.b32.xlu0 %v3195_v13, %s3087_s11 }
 0x6fd   :  { %855 = vrot.lane.b32.xlu0 %v3185_v10, %s3089_s12 }
 0x768   :  { %v738_v45 = vpop.xlane.xlu0 %737 }
 0x769   :  { %2936 = vrcp.f32 %v738_v45 }
 0x76c   :  { %v741_v46 = vpop.xlane.xlu0 %740 }
 0x76d   :  { %2938 = vrcp.f32 %v741_v46 }
 0x770   :  { %v797_v47 = vpop.permute.xlu0 %796 }
 0x771   :  { %v802_v48 = vsel %vm291_vm4, %v797_v47, 0 }
 0x772   :  { %2708 = vmatpush3.bf16.msra.mxu0 %v802_v48 }
 0x773   :  { %2719 = vmatprep.subr.bf16.mxu0 %v3078_v8 }
 0x774   :  { %v856_v59 = vpop.permute.xlu0 %855 }
 0x776   :  { %v2937_v49 = vpop.eup %2936 }
 0x777   :  { %v743_v51 = vmul.f32 %v2937_v49, %v2933_v41 }
 0x779   :  { %v746_v52 = vpack.c.bf16 %v743_v51, %v743_v51 }
 0x77a   :  { %v2939_v53 = vpop.eup %2938 }
 0x77b   :  { %2704 = vmatmul.mubr.msk.bf16.vlgmr.msra.gmra.mxu1 %vm160_vm2, %v746_v52  ;;  %v745_v55 = vmul.f32 %v2939_v53, %v2935_v43 }
 0x77c   :  { %2714 = vmatpush3.bf16.xpose.msra.mxu1 %v863_v54  ;;  %2715 = vmatprep.mubr.msk.bf16.mxu1 %vm3079_vm1, %v3078_v8  ;;  %v2906_v54 = vld [vmem:[#allocation8 + $0x10] ss:$8 sps:$4 sm:$0xff]  }
 0x77d   :  { %v747_v57 = vpack.c.bf16 %v745_v55, %v745_v55  ;;  %2725 = vmatprep.subr.bf16.mxu1 %v3078_v8  ;;  %v2907_v55 = vld [vmem:[#allocation8] ss:$8 sps:$4 sm:$0xff]  }
 0x77f   :  { %2710 = vmatmul.mubr.msk.bf16.vlgmr.msra.gmra.mxu0 %vm160_vm2, %v747_v57 }
 0x780   :  { %2720 = vmatpush3.bf16.xpose.msra.mxu0 %v913_v58  ;;  %2721 = vmatprep.mubr.msk.bf16.mxu0 %vm3079_vm1, %v3078_v8 }
 0x781   :  { %2731 = vmatprep.subr.bf16.mxu0 %v3078_v8 }
 0x783   :  { %2716 = vmatmul.mubr.msk.bf16.vlgmr.msra.gmra.mxu1 %vm160_vm2, %v856_v59 }
 0x784   :  { %2727 = vmatprep.mubr.msk.bf16.mxu1 %vm3079_vm1, %v3078_v8 }
 0x787   :  { %2722 = vmatmul.mubr.msk.bf16.vlgmr.msra.gmra.mxu0 %vm160_vm2, %v906_v60 }
 0x788   :  { %2733 = vmatprep.mubr.msk.bf16.mxu0 %vm3079_vm1, %v3078_v8 }
 0x83b   :  { %v790_v61 = vpop.f32.mrf.mxu1 }
 0x83d   :  { %v2705_v62 = vpop.f32.mrf.mxu1 }
 0x83f   :  { %v793_v0 = vpop.f32.mrf.mxu1  ;;  %v838_v1 = vpop.f32.mrf.mxu0 }
 0x841   :  { %v2706_v3 = vpop.f32.mrf.mxu1  ;;  %v2711_v4 = vpop.f32.mrf.mxu0 }
 0x843   :  { %v841_v7 = vpop.f32.mrf.mxu0  ;;  %v899_v14 = vpop.f32.mrf.mxu1 }
 0x844   :  { %v955_v15 = vmul.f32 0.35355338, %v899_v14 }
 0x845   :  { %v2712_v16 = vpop.f32.mrf.mxu0  ;;  %v2717_v17 = vpop.f32.mrf.mxu1 }
 0x846   :  { %v957_v18 = vsel %vm3217_vm3, %v955_v15, -1000000.0 }
 0x847   :  { %v902_v21 = vpop.f32.mrf.mxu1  ;;  %v949_v23 = vpop.f32.mrf.mxu0  ;;  %v959_v25 = vsel %vm160_vm2, %v957_v18, -inf }
 0x848   :  { %v956_v26 = vmul.f32 0.35355338, %v949_v23  ;;  %960 = vmax.xlane.f32.xlu0 %v959_v25 }
 0x849   :  { %v2718_v27 = vpop.f32.mrf.mxu1  ;;  %v2723_v28 = vpop.f32.mrf.mxu0 }
 0x84a   :  { %v958_v29 = vsel %vm3217_vm3, %v956_v26, -1000000.0  ;;  %v2908_v27 = vld [vmem:[#allocation8 + $0x10] ss:$8 sps:$4 sm:$0xff]   ;;  %v2909_v28 = vld [vmem:[#allocation8] ss:$8 sps:$4 sm:$0xff]  }
 0x84b   :  { %v952_v30 = vpop.f32.mrf.mxu0  ;;  %v962_v31 = vsel %vm160_vm2, %v958_v29, -inf }
 0x84c   :  { %963 = vmax.xlane.f32.xlu1 %v962_v31 }
 0x84d   :  { %v2724_v32 = vpop.f32.mrf.mxu0 }
 0x85d   :  { %983 = vrot.lane.b32.xlu1 %v3185_v10, %s3090_s13 }
 0x861   :  { %611 = vrot.lane.b32.xlu1 %v3303_v63, %s3074_s8 }
 0x865   :  { %613 = vrot.lane.b32.xlu1 %v3305_v2, %s3074_s8 }
 0x869   :  { %848 = vrot.lane.b32.xlu1 %v838_v1, %s3091_s14 }
 0x8d1   :  { %v961_v22 = vpop.xlane.xlu0 %960 }
 0x8d2   :  { %v965_v33 = vsub.f32 %v957_v18, %v961_v22 }
 0x8d4   :  { %v967_v34 = vmul.f32 1.442695, %v965_v33 }
 0x8d5   :  { %v964_v35 = vpop.xlane.xlu1 %963 }
 0x8d6   :  { %2940 = vpow2.f32 %v967_v34  ;;  %v966_v36 = vsub.f32 %v958_v29, %v964_v35 }
 0x8d8   :  { %v969_v37 = vmul.f32 1.442695, %v966_v36 }
 0x8d9   :  { %v984_v38 = vpop.permute.xlu1 %983 }
 0x8da   :  { %2942 = vpow2.f32 %v969_v37  ;;  %v989_v10 = vsel %vm291_vm4, %v984_v38, 0 }
 0x8db   :  { %2726 = vmatpush3.bf16.msra.mxu1 %v989_v10 }
 0x8dc   :  { %2737 = vmatprep.subr.bf16.mxu1 %v3078_v8 }
 0x8dd   :  { %v612_v63 = vpop.permute.xlu1 %611 }
 0x8de   :  { %618 = vst.msk [vmem:[#allocation2] sm:$0xff] %vm617_vm5, %v612_v63 }
 0x8e1   :  { %v614_v2 = vpop.permute.xlu1 %613 }
 0x8e2   :  { %619 = vst.msk [vmem:[#allocation2 + $0x8] sm:$0xff] %vm617_vm5, %v614_v2 }
 0x8e3   :  { %v2941_v39 = vpop.eup %2940 }
 0x8e4   :  { %v971_v40 = vsel %vm160_vm2, %v2941_v39, 0.0 }
 0x8e5   :  { %972 = vadd.xlane.f32.xlu0 %v971_v40  ;;  %v849_v41 = vpop.permute.xlu1 %848 }
 0x8e6   :  { %854 = vst.msk [vmem:[#allocation2 + $0x8] sm:$0xff] %vm852_vm6, %v849_v41  ;;  %v71_v41 = vld [vmem:[#allocation3] sm:$0xff] }
 0x8e7   :  { %v2943_v42 = vpop.eup %2942 }
 0x8e8   :  { %v974_v43 = vsel %vm160_vm2, %v2943_v42, 0.0 }
 0x8e9   :  { %975 = vadd.xlane.f32.xlu0 %v974_v43 }
 0x8ff   :  { %1031 = vrot.lane.b32.xlu0 %v3195_v13, %s3090_s13 }
 0x903   :  { %846 = vrot.lane.b32.xlu0 %v790_v61, %s3091_s14 }
 0x96e   :  { %v973_v44 = vpop.xlane.xlu0 %972 }
 0x96f   :  { %2944 = vrcp.f32 %v973_v44 }
 0x972   :  { %v976_v45 = vpop.xlane.xlu0 %975 }
 0x973   :  { %2946 = vrcp.f32 %v976_v45 }
 0x976   :  { %v1032_v46 = vpop.permute.xlu0 %1031 }
 0x977   :  { %v1037_v47 = vsel %vm291_vm4, %v1032_v46, 0  ;;  %v1178_v46 = vsub.s32 2, %v3211_v19 }
 0x978   :  { %2732 = vmatpush3.bf16.msra.mxu0 %v1037_v47  ;;  %v3407_v47 = vld [vmem:[%s3674_s6] sm:$0xff]  ;;  %s1304_s6 = sld [smem:[#allocation7]] }
 0x979   :  { %2745 = vmatprep.subr.bf16.mxu0 %v3078_v8 }
 0x97a   :  { %v847_v48 = vpop.permute.xlu0 %846 }
 0x97b   :  { %853 = vst.msk [vmem:[#allocation2] sm:$0xff] %vm852_vm6, %v847_v48 }
 0x97c   :  { %v2945_v49 = vpop.eup %2944 }
 0x97d   :  { %v978_v50 = vmul.f32 %v2945_v49, %v2941_v39 }
 0x97f   :  { %v981_v51 = vpack.c.bf16 %v978_v50, %v978_v50  ;;  %v1179_v50 = vrot.slane %v3407_v47, %v1178_v46 }
 0x980   :  { %v2947_v52 = vpop.eup %2946 }
 0x981   :  { %2728 = vmatmul.mubr.msk.bf16.vlgmr.msra.gmra.mxu1 %vm160_vm2, %v981_v51  ;;  %v980_v13 = vmul.f32 %v2947_v52, %v2943_v42  ;;  %v72_v42 = vld [vmem:[#allocation3 + $0x8] sm:$0xff]  ;;  %v1184_v51 = vsub.s32 3, %v3211_v19 }
 0x982   :  { %2741 = vmatprep.mubr.msk.bf16.mxu1 %vm3079_vm1, %v3078_v8  ;;  %2738 = vmatpush3.bf16.msra.mxu1 %v2906_v54  ;;  %v1253_v45 = vpack.c.bf16 %v72_v42, %v71_v41 }
 0x983   :  { %v982_v53 = vpack.c.bf16 %v980_v13, %v980_v13  ;;  %2739 = vmatprep.subr.bf16.mxu1 %v3078_v8  ;;  %v1185_v54 = vrot.slane %v3407_v47, %v1184_v51 }
 0x985   :  { %2734 = vmatmul.mubr.msk.bf16.vlgmr.msra.gmra.mxu0 %vm160_vm2, %v982_v53 }
 0x986   :  { %2749 = vmatprep.mubr.msk.bf16.mxu0 %vm3079_vm1, %v3078_v8  ;;  %2740 = vmatpush3.bf16.msra.mxu1 %v2907_v55 }
 0x987   :  { %2753 = vmatprep.subr.bf16.mxu1 %v3078_v8 }
 0xa41   :  { %v1025_v56 = vpop.f32.mrf.mxu1 }
 0xa42   :  { %1081 = vrot.lane.b32.xlu0 %v1025_v56, %s3092_s1 }
 0xa43   :  { %v2729_v57 = vpop.f32.mrf.mxu1 }
 0xa45   :  { %v1028_v58 = vpop.f32.mrf.mxu1  ;;  %v1073_v59 = vpop.f32.mrf.mxu0 }
 0xa46   :  { %1083 = vrot.lane.b32.xlu1 %v1073_v59, %s3092_s1 }
 0xa47   :  { %v2730_v60 = vpop.f32.mrf.mxu1  ;;  %v2735_v61 = vpop.f32.mrf.mxu0 }
 0xa49   :  { %v1076_v62 = vpop.f32.mrf.mxu0 }
 0xa4b   :  { %v2736_v0 = vpop.f32.mrf.mxu0 }
 0xab4   :  { %v1082_v1 = vpop.permute.xlu0 %1081 }
 0xab5   :  { %1088 = vst.msk [vmem:[#allocation2] sm:$0xff] %vm1087_vm7, %v1082_v1 }
 0xab8   :  { %v1084_v3 = vpop.permute.xlu1 %1083 }
 0xab9   :  { %1089 = vst.msk [vmem:[#allocation2 + $0x8] sm:$0xff] %vm1087_vm7, %v1084_v3 }
 0xabc   :  { %v1090_v4 = vld [vmem:[#allocation2] sm:$0xff] }
 0xac0   :  { %v1091_v7 = vld [vmem:[#allocation2 + $0x8] sm:$0xff] }
 0xac1   :  { %v1092_v14 = vpack.c.bf16 %v1091_v7, %v1090_v4 }
 0xac3   :  { %2742 = vmatmul.mubr.msk.bf16.vlgmr.msra.gmra.mxu1 %vm99_vm0, %v1092_v14 }
 0xac4   :  { %2757 = vmatprep.mubr.msk.bf16.mxu1 %vm3079_vm1, %v3078_v8 }
 0xb83   :  { %v1142_v15 = vpop.f32.mrf.mxu1 }
 0xb84   :  { %v1143_v16 = vadd.f32 %v1142_v15, %v3165_v5 }
 0xb85   :  { %v2743_v17 = vpop.f32.mrf.mxu1 }
 0xb86   :  { %v1149_v18 = vsel %vm99_vm0, %v1143_v16, 0.0 }
 0xb87   :  { %1150 = vadd.xlane.f32.xlu0 %v1149_v18  ;;  %v1145_v21 = vpop.f32.mrf.mxu1 }
 0xb88   :  { %v1146_v23 = vadd.f32 %v1145_v21, %v3170_v6  ;;  %v1305_v21 = vstv %s1304_s6 }
 0xb89   :  { %v2744_v25 = vpop.f32.mrf.mxu1  ;;  %vm3444_vm8 = vcmp.lt.s32.totalorder %v3213_v20, %v1305_v21 }
 0xb8a   :  { %v1152_v26 = vsel %vm99_vm0, %v1146_v23, 0.0 }
 0xb8b   :  { %1153 = vadd.xlane.f32.xlu1 %v1152_v26 }
 0xb9c   :  { %1256 = vrot.lane.b32.xlu1 %v2908_v27, %s3081_s3 }
 0xba0   :  { %1205 = vrot.lane.b32.xlu1 %v2908_v27, %s3080_s0  ;;  %v1307_v27 = vstv %s2535_s17 }
 0xba1   :  { %vm3452_vm9 = vcmp.lt.s32.totalorder %v3213_v20, %v1307_v27 }
 0xba4   :  { %1203 = vrot.lane.b32.xlu1 %v2909_v28, %s3080_s0 }
 0xc10   :  { %v1151_v5 = vpop.xlane.xlu0 %1150 }
 0xc11   :  { %v1156_v29 = vmul.f32 0.03125, %v1151_v5 }
 0xc13   :  { %v1158_v30 = vsub.f32 %v1143_v16, %v1156_v29 }
 0xc14   :  { %v1154_v31 = vpop.xlane.xlu1 %1153 }
 0xc15   :  { %v1157_v32 = vmul.f32 0.03125, %v1154_v31  ;;  %v1160_v22 = vmul.f32 %v1158_v30, %v1158_v30 }
 0xc17   :  { %v1159_v33 = vsub.f32 %v1146_v23, %v1157_v32  ;;  %v1162_v6 = vsel %vm99_vm0, %v1160_v22, 0.0 }
 0xc18   :  { %1163 = vadd.xlane.f32.xlu0 %v1162_v6  ;;  %v1257_v36 = vpop.permute.xlu1 %1256 }
 0xc19   :  { %v1161_v34 = vmul.f32 %v1159_v33, %v1159_v33  ;;  %2754 = vmatpush3.bf16.msra.mxu1 %v1257_v36 }
 0xc1a   :  { %2755 = vmatprep.subr.bf16.mxu1 %v3078_v8 }
 0xc1b   :  { %v1165_v35 = vsel %vm99_vm0, %v1161_v34, 0.0 }
 0xc1c   :  { %1166 = vadd.xlane.f32.xlu0 %v1165_v35  ;;  %v1206_v37 = vpop.permute.xlu1 %1205 }
 0xc1d   :  { %2746 = vmatpush3.bf16.msra.mxu0 %v1206_v37 }
 0xc1e   :  { %2747 = vmatprep.subr.bf16.mxu0 %v3078_v8 }
 0xc20   :  { %v1204_v38 = vpop.permute.xlu1 %1203 }
 0xc21   :  { %2748 = vmatpush3.bf16.msra.mxu0 %v1204_v38 }
 0xc22   :  { %2761 = vmatprep.subr.bf16.mxu0 %v3078_v8 }
 0xc32   :  { %1254 = vrot.lane.b32.xlu0 %v2909_v28, %s3081_s3 }
 0xca1   :  { %v1164_v10 = vpop.xlane.xlu0 %1163 }
 0xca2   :  { %v1168_v63 = vmul.f32 0.03125, %v1164_v10 }
 0xca4   :  { %v1170_v2 = vadd.f32 1e-05, %v1168_v63 }
 0xca5   :  { %v1167_v39 = vpop.xlane.xlu0 %1166 }
 0xca6   :  { %2948 = vrsqrt.f32 %v1170_v2  ;;  %v1169_v40 = vmul.f32 0.03125, %v1167_v39 }
 0xca8   :  { %v1171_v43 = vadd.f32 1e-05, %v1169_v40 }
 0xca9   :  { %v1255_v44 = vpop.permute.xlu0 %1254 }
 0xcaa   :  { %2950 = vrsqrt.f32 %v1171_v43  ;;  %2756 = vmatpush3.bf16.msra.mxu1 %v1255_v44 }
 0xcab   :  { %2767 = vmatprep.subr.bf16.mxu1 %v3078_v8 }
 0xcad   :  { %2758 = vmatmul.mubr.msk.bf16.vlgmr.msra.gmra.mxu1 %vm99_vm0, %v1253_v45 }
 0xcae   :  { %2769 = vmatprep.mubr.msk.bf16.mxu1 %vm3079_vm1, %v3078_v8 }
 0xcb3   :  { %v2949_v48 = vpop.eup %2948 }
 0xcb4   :  { %v1174_v49 = vmul.f32 %v2949_v48, %v1158_v30 }
 0xcb6   :  { %v1180_v53 = vmul.f32 %v1179_v50, %v1174_v49 }
 0xcb7   :  { %v2951_v52 = vpop.eup %2950 }
 0xcb8   :  { %v1175_v13 = vmul.f32 %v2951_v52, %v1159_v33  ;;  %v3412_v56 = vadd.f32 %v1185_v54, %v1180_v53 }
 0xcba   :  { %v1181_v55 = vmul.f32 %v1179_v50, %v1175_v13 }
 0xcbc   :  { %v3414_v57 = vadd.f32 %v1185_v54, %v1181_v55 }
 0xcbe   :  { %v1188_v58 = vpack.c.bf16 %v3414_v57, %v3412_v56 }
 0xcc0   :  { %2750 = vmatmul.mubr.msk.bf16.vlgmr.msra.gmra.mxu0 %vm99_vm0, %v1188_v58 }
 0xcc1   :  { %2763 = vmatprep.mubr.msk.bf16.mxu0 %vm3079_vm1, %v3078_v8 }
 0xd6d   :  { %v1297_v59 = vpop.f32.mrf.mxu1 }
 0xd6e   :  { %v3421_v60 = vpack.c.bf16 %v1297_v59, %v1297_v59 }
 0xd6f   :  { %v2759_v61 = vpop.f32.mrf.mxu1 }
 0xd70   :  { %v1322_v62 = vsel %vm160_vm2, %v3421_v60, 0 }
 0xd71   :  { %v1300_v0 = vpop.f32.mrf.mxu1  ;;  %2762 = vmatpush3.bf16.xpose.msra.mxu0 %v1322_v62 }
 0xd72   :  { %v3425_v1 = vpack.c.bf16 %v1300_v0, %v1300_v0  ;;  %2773 = vmatprep.subr.bf16.mxu0 %v3078_v8 }
 0xd73   :  { %v2760_v3 = vpop.f32.mrf.mxu1 }
 0xd74   :  { %v1368_v4 = vsel %vm160_vm2, %v3425_v1, 0 }
 0xd75   :  { %2768 = vmatpush3.bf16.xpose.msra.mxu1 %v1368_v4 }
 0xd76   :  { %2779 = vmatprep.subr.bf16.mxu1 %v3078_v8 }
 0xd80   :  { %v1246_v7 = vpop.f32.mrf.mxu0 }
 0xd81   :  { %v3431_v14 = vpack.c.bf16 %v1246_v7, %v1246_v7 }
 0xd82   :  { %v2751_v15 = vpop.f32.mrf.mxu0 }
 0xd83   :  { %2764 = vmatmul.mubr.msk.bf16.vlgmr.msra.gmra.mxu0 %vm160_vm2, %v3431_v14 }
 0xd84   :  { %v1249_v16 = vpop.f32.mrf.mxu0  ;;  %2775 = vmatprep.mubr.msk.bf16.mxu0 %vm3079_vm1, %v3078_v8 }
 0xd85   :  { %v3437_v17 = vpack.c.bf16 %v1249_v16, %v1249_v16 }
 0xd86   :  { %v2752_v18 = vpop.f32.mrf.mxu0 }
 0xd87   :  { %2770 = vmatmul.mubr.msk.bf16.vlgmr.msra.gmra.mxu1 %vm160_vm2, %v3437_v17 }
 0xd88   :  { %2781 = vmatprep.mubr.msk.bf16.mxu1 %vm3079_vm1, %v3078_v8 }
 0xe43   :  { %v1358_v23 = vpop.f32.mrf.mxu0 }
 0xe44   :  { %v1410_v26 = vmul.f32 0.35355338, %v1358_v23 }
 0xe45   :  { %v2765_v28 = vpop.f32.mrf.mxu0 }
 0xe46   :  { %v1412_v5 = vsel %vm3444_vm8, %v1410_v26, -1000000.0 }
 0xe47   :  { %v1361_v29 = vpop.f32.mrf.mxu0  ;;  %v1404_v30 = vpop.f32.mrf.mxu1  ;;  %v1414_v31 = vsel %vm160_vm2, %v1412_v5, -inf }
 0xe48   :  { %v1411_v22 = vmul.f32 0.35355338, %v1404_v30  ;;  %1415 = vmax.xlane.f32.xlu0 %v1414_v31 }
 0xe49   :  { %v2766_v33 = vpop.f32.mrf.mxu0  ;;  %v2771_v6 = vpop.f32.mrf.mxu1 }
 0xe4a   :  { %v1413_v34 = vsel %vm3452_vm9, %v1411_v22, -1000000.0 }
 0xe4b   :  { %v1407_v35 = vpop.f32.mrf.mxu1  ;;  %v1417_v36 = vsel %vm160_vm2, %v1413_v34, -inf }
 0xe4c   :  { %1418 = vmax.xlane.f32.xlu1 %v1417_v36 }
 0xe4d   :  { %v2772_v37 = vpop.f32.mrf.mxu1 }
 0xe5d   :  { %1439 = vrot.lane.b32.xlu1 %v3421_v60, %s3080_s0 }
 0xe61   :  { %1541 = vrot.lane.b32.xlu1 %v3421_v60, %s3083_s28 }
 0xe65   :  { %1592 = vrot.lane.b32.xlu1 %v3425_v1, %s3083_s28 }
 0xe69   :  { %1590 = vrot.lane.b32.xlu1 %v3437_v17, %s3083_s28 }
 0xed1   :  { %v1416_v20 = vpop.xlane.xlu0 %1415 }
 0xed2   :  { %v1420_v38 = vsub.f32 %v1412_v5, %v1416_v20 }
 0xed4   :  { %v1422_v10 = vmul.f32 1.442695, %v1420_v38 }
 0xed5   :  { %v1419_v63 = vpop.xlane.xlu1 %1418 }
 0xed6   :  { %2952 = vpow2.f32 %v1422_v10  ;;  %v1421_v2 = vsub.f32 %v1413_v34, %v1419_v63 }
 0xed8   :  { %v1424_v39 = vmul.f32 1.442695, %v1421_v2 }
 0xed9   :  { %v1440_v40 = vpop.permute.xlu1 %1439 }
 0xeda   :  { %2954 = vpow2.f32 %v1424_v39  ;;  %v1445_v41 = vsel %vm291_vm4, %v1440_v40, 0 }
 0xedb   :  { %2774 = vmatpush3.bf16.msra.mxu0 %v1445_v41 }
 0xedc   :  { %2785 = vmatprep.subr.bf16.mxu0 %v3078_v8 }
 0xedd   :  { %v1542_v52 = vpop.permute.xlu1 %1541 }
 0xede   :  { %v1547_v55 = vsel %vm160_vm2, %v1542_v52, 0 }
 0xee1   :  { %v1593_v59 = vpop.permute.xlu1 %1592 }
 0xee2   :  { %v1598_v62 = vsel %vm160_vm2, %v1593_v59, 0 }
 0xee3   :  { %v2953_v42 = vpop.eup %2952 }
 0xee4   :  { %v1426_v43 = vsel %vm160_vm2, %v2953_v42, 0.0 }
 0xee5   :  { %1427 = vadd.xlane.f32.xlu0 %v1426_v43  ;;  %v1591_v3 = vpop.permute.xlu1 %1590 }
 0xee7   :  { %v2955_v44 = vpop.eup %2954 }
 0xee8   :  { %v1429_v45 = vsel %vm160_vm2, %v2955_v44, 0.0 }
 0xee9   :  { %1430 = vadd.xlane.f32.xlu0 %v1429_v45 }
 0xeff   :  { %1488 = vrot.lane.b32.xlu0 %v3425_v1, %s3080_s0 }
 0xf03   :  { %1539 = vrot.lane.b32.xlu0 %v3431_v14, %s3083_s28 }
 0xf6e   :  { %v1428_v46 = vpop.xlane.xlu0 %1427 }
 0xf6f   :  { %2956 = vrcp.f32 %v1428_v46 }
 0xf72   :  { %v1431_v48 = vpop.xlane.xlu0 %1430 }
 0xf73   :  { %2958 = vrcp.f32 %v1431_v48 }
 0xf76   :  { %v1489_v49 = vpop.permute.xlu0 %1488 }
 0xf77   :  { %v1494_v50 = vsel %vm291_vm4, %v1489_v49, 0 }
 0xf78   :  { %2780 = vmatpush3.bf16.msra.mxu1 %v1494_v50 }
 0xf79   :  { %2791 = vmatprep.subr.bf16.mxu1 %v3078_v8 }
 0xf7a   :  { %v1540_v0 = vpop.permute.xlu0 %1539 }
 0xf7c   :  { %v2957_v51 = vpop.eup %2956 }
 0xf7d   :  { %v1433_v13 = vmul.f32 %v2957_v51, %v2953_v42 }
 0xf7f   :  { %v1436_v53 = vpack.c.bf16 %v1433_v13, %v1433_v13 }
 0xf80   :  { %v2959_v54 = vpop.eup %2958 }
 0xf81   :  { %2776 = vmatmul.mubr.msk.bf16.vlgmr.msra.gmra.mxu0 %vm160_vm2, %v1436_v53  ;;  %v1435_v58 = vmul.f32 %v2959_v54, %v2955_v44 }
 0xf82   :  { %2786 = vmatpush3.bf16.xpose.msra.mxu0 %v1547_v55  ;;  %2787 = vmatprep.mubr.msk.bf16.mxu0 %vm3079_vm1, %v3078_v8 }
 0xf83   :  { %v1437_v61 = vpack.c.bf16 %v1435_v58, %v1435_v58  ;;  %2797 = vmatprep.subr.bf16.mxu0 %v3078_v8 }
 0xf85   :  { %2782 = vmatmul.mubr.msk.bf16.vlgmr.msra.gmra.mxu1 %vm160_vm2, %v1437_v61 }
 0xf86   :  { %2792 = vmatpush3.bf16.xpose.msra.mxu1 %v1598_v62  ;;  %2793 = vmatprep.mubr.msk.bf16.mxu1 %vm3079_vm1, %v3078_v8 }
 0xf87   :  { %2803 = vmatprep.subr.bf16.mxu1 %v3078_v8 }
 0xf89   :  { %2788 = vmatmul.mubr.msk.bf16.vlgmr.msra.gmra.mxu0 %vm160_vm2, %v1540_v0 }
 0xf8a   :  { %2799 = vmatprep.mubr.msk.bf16.mxu0 %vm3079_vm1, %v3078_v8 }
 0xf8d   :  { %2794 = vmatmul.mubr.msk.bf16.vlgmr.msra.gmra.mxu1 %vm160_vm2, %v1591_v3 }
 0xf8e   :  { %2805 = vmatprep.mubr.msk.bf16.mxu1 %vm3079_vm1, %v3078_v8 }
0x1041   :  { %v1481_v4 = vpop.f32.mrf.mxu0 }
0x1042   :  { %1536 = vst.msk [vmem:[#allocation2] sm:$0xff] %vm160_vm2, %v1481_v4 }
0x1043   :  { %v2777_v7 = vpop.f32.mrf.mxu0 }
0x1045   :  { %v1484_v15 = vpop.f32.mrf.mxu0  ;;  %v1530_v16 = vpop.f32.mrf.mxu1 }
0x1046   :  { %1537 = vst.msk [vmem:[#allocation2 + $0x8] sm:$0xff] %vm160_vm2, %v1530_v16 }
0x1047   :  { %v2778_v18 = vpop.f32.mrf.mxu0  ;;  %v2783_v21 = vpop.f32.mrf.mxu1 }
0x1049   :  { %v1533_v23 = vpop.f32.mrf.mxu1  ;;  %v1583_v26 = vpop.f32.mrf.mxu0 }
0x104a   :  { %v1640_v27 = vmul.f32 0.35355338, %v1583_v26 }
0x104b   :  { %v2784_v28 = vpop.f32.mrf.mxu1  ;;  %v2789_v5 = vpop.f32.mrf.mxu0 }
0x104c   :  { %v1642_v29 = vsel %vm3444_vm8, %v1640_v27, -1000000.0 }
0x104d   :  { %v1586_v30 = vpop.f32.mrf.mxu0  ;;  %v1634_v31 = vpop.f32.mrf.mxu1  ;;  %v1644_v22 = vsel %vm160_vm2, %v1642_v29, -inf }
0x104e   :  { %v1641_v33 = vmul.f32 0.35355338, %v1634_v31  ;;  %1645 = vmax.xlane.f32.xlu0 %v1644_v22 }
0x104f   :  { %v2790_v6 = vpop.f32.mrf.mxu0  ;;  %v2795_v34 = vpop.f32.mrf.mxu1 }
0x1050   :  { %v1643_v35 = vsel %vm3452_vm9, %v1641_v33, -1000000.0 }
0x1051   :  { %v1637_v36 = vpop.f32.mrf.mxu1  ;;  %v1647_v37 = vsel %vm160_vm2, %v1643_v35, -inf }
0x1052   :  { %1648 = vmax.xlane.f32.xlu1 %v1647_v37 }
0x1053   :  { %v2796_v20 = vpop.f32.mrf.mxu1 }
0x1063   :  { %1668 = vrot.lane.b32.xlu1 %v3421_v60, %s3082_s27 }
0x1067   :  { %1776 = vrot.lane.b32.xlu1 %v3421_v60, %s3086_s10 }
0x106b   :  { %1826 = vrot.lane.b32.xlu1 %v3425_v1, %s3086_s10 }
0x106f   :  { %1824 = vrot.lane.b32.xlu1 %v3437_v17, %s3086_s10 }
0x10d7   :  { %v1646_v38 = vpop.xlane.xlu0 %1645 }
0x10d8   :  { %v1650_v10 = vsub.f32 %v1642_v29, %v1646_v38 }
0x10da   :  { %v1652_v63 = vmul.f32 1.442695, %v1650_v10 }
0x10db   :  { %v1649_v2 = vpop.xlane.xlu1 %1648 }
0x10dc   :  { %2960 = vpow2.f32 %v1652_v63  ;;  %v1651_v39 = vsub.f32 %v1643_v35, %v1649_v2 }
0x10de   :  { %v1654_v40 = vmul.f32 1.442695, %v1651_v39 }
0x10df   :  { %v1669_v41 = vpop.permute.xlu1 %1668 }
0x10e0   :  { %2962 = vpow2.f32 %v1654_v40  ;;  %v1674_v42 = vsel %vm291_vm4, %v1669_v41, 0 }
0x10e1   :  { %2798 = vmatpush3.bf16.msra.mxu0 %v1674_v42 }
0x10e2   :  { %2809 = vmatprep.subr.bf16.mxu0 %v3078_v8 }
0x10e3   :  { %v1777_v13 = vpop.permute.xlu1 %1776 }
0x10e4   :  { %v1782_v58 = vsel %vm160_vm2, %v1777_v13, 0 }
0x10e7   :  { %v1827_v61 = vpop.permute.xlu1 %1826 }
0x10e8   :  { %v1832_v0 = vsel %vm160_vm2, %v1827_v61, 0 }
0x10e9   :  { %v2961_v43 = vpop.eup %2960 }
0x10ea   :  { %v1656_v44 = vsel %vm160_vm2, %v2961_v43, 0.0 }
0x10eb   :  { %1657 = vadd.xlane.f32.xlu0 %v1656_v44  ;;  %v1825_v4 = vpop.permute.xlu1 %1824 }
0x10ed   :  { %v2963_v45 = vpop.eup %2962 }
0x10ee   :  { %v1659_v46 = vsel %vm160_vm2, %v2963_v45, 0.0 }
0x10ef   :  { %1660 = vadd.xlane.f32.xlu0 %v1659_v46 }
0x1105   :  { %1716 = vrot.lane.b32.xlu0 %v3425_v1, %s3082_s27 }
0x1109   :  { %1774 = vrot.lane.b32.xlu0 %v3431_v14, %s3086_s10 }
0x1174   :  { %v1658_v48 = vpop.xlane.xlu0 %1657 }
0x1175   :  { %2964 = vrcp.f32 %v1658_v48 }
0x1178   :  { %v1661_v49 = vpop.xlane.xlu0 %1660 }
0x1179   :  { %2966 = vrcp.f32 %v1661_v49 }
0x117c   :  { %v1717_v50 = vpop.permute.xlu0 %1716 }
0x117d   :  { %v1722_v51 = vsel %vm291_vm4, %v1717_v50, 0 }
0x117e   :  { %2804 = vmatpush3.bf16.msra.mxu1 %v1722_v51 }
0x117f   :  { %2815 = vmatprep.subr.bf16.mxu1 %v3078_v8 }
0x1180   :  { %v1775_v3 = vpop.permute.xlu0 %1774 }
0x1182   :  { %v2965_v52 = vpop.eup %2964 }
0x1183   :  { %v1663_v53 = vmul.f32 %v2965_v52, %v2961_v43 }
0x1185   :  { %v1666_v54 = vpack.c.bf16 %v1663_v53, %v1663_v53 }
0x1186   :  { %v2967_v55 = vpop.eup %2966 }
0x1187   :  { %2800 = vmatmul.mubr.msk.bf16.vlgmr.msra.gmra.mxu0 %vm160_vm2, %v1666_v54  ;;  %v1665_v59 = vmul.f32 %v2967_v55, %v2963_v45 }
0x1188   :  { %2810 = vmatpush3.bf16.xpose.msra.mxu0 %v1782_v58  ;;  %2811 = vmatprep.mubr.msk.bf16.mxu0 %vm3079_vm1, %v3078_v8 }
0x1189   :  { %v1667_v62 = vpack.c.bf16 %v1665_v59, %v1665_v59  ;;  %2821 = vmatprep.subr.bf16.mxu0 %v3078_v8 }
0x118b   :  { %2806 = vmatmul.mubr.msk.bf16.vlgmr.msra.gmra.mxu1 %vm160_vm2, %v1667_v62 }
0x118c   :  { %2816 = vmatpush3.bf16.xpose.msra.mxu1 %v1832_v0  ;;  %2817 = vmatprep.mubr.msk.bf16.mxu1 %vm3079_vm1, %v3078_v8 }
0x118d   :  { %2827 = vmatprep.subr.bf16.mxu1 %v3078_v8 }
0x118f   :  { %2812 = vmatmul.mubr.msk.bf16.vlgmr.msra.gmra.mxu0 %vm160_vm2, %v1775_v3 }
0x1190   :  { %2823 = vmatprep.mubr.msk.bf16.mxu0 %vm3079_vm1, %v3078_v8 }
0x1193   :  { %2818 = vmatmul.mubr.msk.bf16.vlgmr.msra.gmra.mxu1 %vm160_vm2, %v1825_v4 }
0x1194   :  { %2829 = vmatprep.mubr.msk.bf16.mxu1 %vm3079_vm1, %v3078_v8 }
0x1247   :  { %v3535_v7 = vpop.f32.mrf.mxu0 }
0x1249   :  { %v2801_v15 = vpop.f32.mrf.mxu0 }
0x124b   :  { %v1713_v16 = vpop.f32.mrf.mxu0  ;;  %v3537_v18 = vpop.f32.mrf.mxu1 }
0x124d   :  { %v2802_v21 = vpop.f32.mrf.mxu0  ;;  %v2807_v23 = vpop.f32.mrf.mxu1 }
0x124f   :  { %v1761_v26 = vpop.f32.mrf.mxu1  ;;  %v1818_v27 = vpop.f32.mrf.mxu0 }
0x1250   :  { %v1874_v28 = vmul.f32 0.35355338, %v1818_v27 }
0x1251   :  { %v2808_v5 = vpop.f32.mrf.mxu1  ;;  %v2813_v29 = vpop.f32.mrf.mxu0 }
0x1252   :  { %v1876_v30 = vsel %vm3444_vm8, %v1874_v28, -1000000.0 }
0x1253   :  { %v1821_v31 = vpop.f32.mrf.mxu0  ;;  %v1868_v22 = vpop.f32.mrf.mxu1  ;;  %v1878_v33 = vsel %vm160_vm2, %v1876_v30, -inf }
0x1254   :  { %v1875_v6 = vmul.f32 0.35355338, %v1868_v22  ;;  %1879 = vmax.xlane.f32.xlu0 %v1878_v33 }
0x1255   :  { %v2814_v34 = vpop.f32.mrf.mxu0  ;;  %v2819_v35 = vpop.f32.mrf.mxu1 }
0x1256   :  { %v1877_v36 = vsel %vm3452_vm9, %v1875_v6, -1000000.0 }
0x1257   :  { %v1871_v37 = vpop.f32.mrf.mxu1  ;;  %v1881_v20 = vsel %vm160_vm2, %v1877_v36, -inf }
0x1258   :  { %1882 = vmax.xlane.f32.xlu1 %v1881_v20 }
0x1259   :  { %v2820_v38 = vpop.f32.mrf.mxu1 }
0x1269   :  { %1902 = vrot.lane.b32.xlu1 %v3421_v60, %s3085_s9 }
0x126d   :  { %2010 = vrot.lane.b32.xlu1 %v3421_v60, %s3089_s12 }
0x1271   :  { %2060 = vrot.lane.b32.xlu1 %v3425_v1, %s3089_s12 }
0x1275   :  { %2058 = vrot.lane.b32.xlu1 %v3437_v17, %s3089_s12 }
0x12dd   :  { %v1880_v10 = vpop.xlane.xlu0 %1879 }
0x12de   :  { %v1884_v63 = vsub.f32 %v1876_v30, %v1880_v10 }
0x12e0   :  { %v1886_v2 = vmul.f32 1.442695, %v1884_v63 }
0x12e1   :  { %v1883_v39 = vpop.xlane.xlu1 %1882 }
0x12e2   :  { %2968 = vpow2.f32 %v1886_v2  ;;  %v1885_v40 = vsub.f32 %v1877_v36, %v1883_v39 }
0x12e4   :  { %v1888_v41 = vmul.f32 1.442695, %v1885_v40 }
0x12e5   :  { %v1903_v42 = vpop.permute.xlu1 %1902 }
0x12e6   :  { %2970 = vpow2.f32 %v1888_v41  ;;  %v1908_v43 = vsel %vm291_vm4, %v1903_v42, 0 }
0x12e7   :  { %2822 = vmatpush3.bf16.msra.mxu0 %v1908_v43 }
0x12e8   :  { %2833 = vmatprep.subr.bf16.mxu0 %v3078_v8 }
0x12e9   :  { %v2011_v13 = vpop.permute.xlu1 %2010 }
0x12ea   :  { %v2016_v58 = vsel %vm160_vm2, %v2011_v13, 0 }
0x12ed   :  { %v2061_v59 = vpop.permute.xlu1 %2060 }
0x12ee   :  { %v2066_v62 = vsel %vm160_vm2, %v2061_v59, 0  ;;  %v2911_v59 = vld [vmem:[#allocation8 + $0x4] ss:$8 sps:$4 sm:$0xff]  }
0x12ef   :  { %v2969_v44 = vpop.eup %2968 }
0x12f0   :  { %v1890_v45 = vsel %vm160_vm2, %v2969_v44, 0.0 }
0x12f1   :  { %1891 = vadd.xlane.f32.xlu0 %v1890_v45  ;;  %v2059_v3 = vpop.permute.xlu1 %2058 }
0x12f3   :  { %v2971_v46 = vpop.eup %2970 }
0x12f4   :  { %v1893_v17 = vsel %vm160_vm2, %v2971_v46, 0.0 }
0x12f5   :  { %1894 = vadd.xlane.f32.xlu0 %v1893_v17 }
0x130b   :  { %1950 = vrot.lane.b32.xlu0 %v3425_v1, %s3085_s9 }
0x130f   :  { %2008 = vrot.lane.b32.xlu0 %v3431_v14, %s3089_s12 }
0x137a   :  { %v1892_v48 = vpop.xlane.xlu0 %1891 }
0x137b   :  { %2972 = vrcp.f32 %v1892_v48 }
0x137e   :  { %v1895_v49 = vpop.xlane.xlu0 %1894 }
0x137f   :  { %2974 = vrcp.f32 %v1895_v49 }
0x1382   :  { %v1951_v50 = vpop.permute.xlu0 %1950 }
0x1383   :  { %v1956_v51 = vsel %vm291_vm4, %v1951_v50, 0 }
0x1384   :  { %2828 = vmatpush3.bf16.msra.mxu1 %v1956_v51 }
0x1385   :  { %2839 = vmatprep.subr.bf16.mxu1 %v3078_v8 }
0x1386   :  { %v2009_v0 = vpop.permute.xlu0 %2008 }
0x1388   :  { %v2973_v52 = vpop.eup %2972 }
0x1389   :  { %v1897_v53 = vmul.f32 %v2973_v52, %v2969_v44 }
0x138b   :  { %v1900_v54 = vpack.c.bf16 %v1897_v53, %v1897_v53 }
0x138c   :  { %v2975_v55 = vpop.eup %2974 }
0x138d   :  { %2824 = vmatmul.mubr.msk.bf16.vlgmr.msra.gmra.mxu0 %vm160_vm2, %v1900_v54  ;;  %v1899_v14 = vmul.f32 %v2975_v55, %v2971_v46 }
0x138e   :  { %2834 = vmatpush3.bf16.xpose.msra.mxu0 %v2016_v58  ;;  %2835 = vmatprep.mubr.msk.bf16.mxu0 %vm3079_vm1, %v3078_v8  ;;  %v2910_v58 = vld [vmem:[#allocation8 + $0x14] ss:$8 sps:$4 sm:$0xff]  }
0x138f   :  { %v1901_v61 = vpack.c.bf16 %v1899_v14, %v1899_v14  ;;  %2845 = vmatprep.subr.bf16.mxu0 %v3078_v8  ;;  %v2341_v14 = vsub.s32 0, %v3211_v19 }
0x1391   :  { %2830 = vmatmul.mubr.msk.bf16.vlgmr.msra.gmra.mxu1 %vm160_vm2, %v1901_v61 }
0x1392   :  { %2840 = vmatpush3.bf16.xpose.msra.mxu1 %v2066_v62  ;;  %2841 = vmatprep.mubr.msk.bf16.mxu1 %vm3079_vm1, %v3078_v8  ;;  %v2342_v62 = vrot.slane %v3407_v47, %v2341_v14  ;;  %v2329_v14 = vsub.s32 4, %v3211_v19 }
0x1393   :  { %2851 = vmatprep.subr.bf16.mxu1 %v3078_v8 }
0x1395   :  { %2836 = vmatmul.mubr.msk.bf16.vlgmr.msra.gmra.mxu0 %vm160_vm2, %v2009_v0 }
0x1396   :  { %2847 = vmatprep.mubr.msk.bf16.mxu0 %vm3079_vm1, %v3078_v8 }
0x1399   :  { %2842 = vmatmul.mubr.msk.bf16.vlgmr.msra.gmra.mxu1 %vm160_vm2, %v2059_v3  ;;  %v2912_v3 = vld [vmem:[%s3673_s5 + $0x18] sm:$0xff]  }
0x139a   :  { %2853 = vmatprep.mubr.msk.bf16.mxu1 %vm3079_vm1, %v3078_v8 }
0x144d   :  { %v1944_v4 = vpop.f32.mrf.mxu0 }
0x144f   :  { %v2825_v15 = vpop.f32.mrf.mxu0 }
0x1451   :  { %v1947_v16 = vpop.f32.mrf.mxu0  ;;  %v1992_v21 = vpop.f32.mrf.mxu1 }
0x1452   :  { %v2913_v16 = vld [vmem:[%s3673_s5 + $0x10] sm:$0xff]  }
0x1453   :  { %v2826_v23 = vpop.f32.mrf.mxu0  ;;  %v2831_v26 = vpop.f32.mrf.mxu1 }
0x1455   :  { %v1995_v27 = vpop.f32.mrf.mxu1  ;;  %v2052_v28 = vpop.f32.mrf.mxu0 }
0x1456   :  { %v2108_v5 = vmul.f32 0.35355338, %v2052_v28  ;;  %v2914_v27 = vld [vmem:[%s3673_s5 + $0x8] sm:$0xff]  }
0x1457   :  { %v2832_v29 = vpop.f32.mrf.mxu1  ;;  %v2837_v30 = vpop.f32.mrf.mxu0 }
0x1458   :  { %v2110_v31 = vsel %vm3444_vm8, %v2108_v5, -1000000.0  ;;  %v2915_v5 = vld [vmem:[%s3673_s5] sm:$0xff]   ;;  %s3093_s5 = smov 32  }
0x1459   :  { %v2055_v22 = vpop.f32.mrf.mxu0  ;;  %v2102_v33 = vpop.f32.mrf.mxu1  ;;  %v2112_v6 = vsel %vm160_vm2, %v2110_v31, -inf }
0x145a   :  { %v2109_v34 = vmul.f32 0.35355338, %v2102_v33  ;;  %2113 = vmax.xlane.f32.xlu0 %v2112_v6 }
0x145b   :  { %v2838_v35 = vpop.f32.mrf.mxu0  ;;  %v2843_v36 = vpop.f32.mrf.mxu1 }
0x145c   :  { %v2111_v37 = vsel %vm3452_vm9, %v2109_v34, -1000000.0 }
0x145d   :  { %v2105_v20 = vpop.f32.mrf.mxu1  ;;  %v2115_v38 = vsel %vm160_vm2, %v2111_v37, -inf }
0x145e   :  { %2116 = vmax.xlane.f32.xlu1 %v2115_v38 }
0x145f   :  { %v2844_v10 = vpop.f32.mrf.mxu1 }
0x146f   :  { %2136 = vrot.lane.b32.xlu1 %v3421_v60, %s3088_s2 }
0x1473   :  { %1766 = vrot.lane.b32.xlu1 %v3535_v7, %s3074_s8 }
0x1477   :  { %1768 = vrot.lane.b32.xlu1 %v3537_v18, %s3074_s8 }
0x147b   :  { %2002 = vrot.lane.b32.xlu1 %v1992_v21, %s3091_s14 }
0x14e3   :  { %v2114_v25 = vpop.xlane.xlu0 %2113 }
0x14e4   :  { %v2118_v63 = vsub.f32 %v2110_v31, %v2114_v25 }
0x14e6   :  { %v2120_v32 = vmul.f32 1.442695, %v2118_v63 }
0x14e7   :  { %v2117_v2 = vpop.xlane.xlu1 %2116 }
0x14e8   :  { %2976 = vpow2.f32 %v2120_v32  ;;  %v2119_v39 = vsub.f32 %v2111_v37, %v2117_v2 }
0x14ea   :  { %v2122_v40 = vmul.f32 1.442695, %v2119_v39 }
0x14eb   :  { %v2137_v41 = vpop.permute.xlu1 %2136 }
0x14ec   :  { %2978 = vpow2.f32 %v2122_v40  ;;  %v2142_v42 = vsel %vm291_vm4, %v2137_v41, 0 }
0x14ed   :  { %2846 = vmatpush3.bf16.msra.mxu0 %v2142_v42 }
0x14ee   :  { %2857 = vmatprep.subr.bf16.mxu0 %v3078_v8 }
0x14ef   :  { %v1767_v60 = vpop.permute.xlu1 %1766 }
0x14f0   :  { %1772 = vst.msk [vmem:[#allocation2] sm:$0xff] %vm617_vm5, %v1767_v60 }
0x14f3   :  { %v1769_v7 = vpop.permute.xlu1 %1768 }
0x14f4   :  { %1773 = vst.msk [vmem:[#allocation2 + $0x8] sm:$0xff] %vm617_vm5, %v1769_v7 }
0x14f5   :  { %v2977_v18 = vpop.eup %2976 }
0x14f6   :  { %v2124_v43 = vsel %vm160_vm2, %v2977_v18, 0.0 }
0x14f7   :  { %v2003_v44 = vpop.permute.xlu1 %2002  ;;  %2125 = vadd.xlane.f32.xlu0 %v2124_v43 }
0x14f8   :  { %2007 = vst.msk [vmem:[#allocation2 + $0x8] sm:$0xff] %vm852_vm6, %v2003_v44 }
0x14f9   :  { %v2979_v45 = vpop.eup %2978 }
0x14fa   :  { %v2127_v46 = vsel %vm160_vm2, %v2979_v45, 0.0 }
0x14fb   :  { %2128 = vadd.xlane.f32.xlu0 %v2127_v46 }
0x1511   :  { %2184 = vrot.lane.b32.xlu0 %v3425_v1, %s3088_s2 }
0x1515   :  { %2000 = vrot.lane.b32.xlu0 %v1944_v4, %s3091_s14 }
0x1580   :  { %v2126_v17 = vpop.xlane.xlu0 %2125 }
0x1581   :  { %2980 = vrcp.f32 %v2126_v17 }
0x1584   :  { %v2129_v48 = vpop.xlane.xlu0 %2128 }
0x1585   :  { %2982 = vrcp.f32 %v2129_v48 }
0x1588   :  { %v2185_v49 = vpop.permute.xlu0 %2184 }
0x1589   :  { %v2190_v50 = vsel %vm291_vm4, %v2185_v49, 0 }
0x158a   :  { %2852 = vmatpush3.bf16.msra.mxu1 %v2190_v50 }
0x158b   :  { %2865 = vmatprep.subr.bf16.mxu1 %v3078_v8 }
0x158c   :  { %v2001_v51 = vpop.permute.xlu0 %2000 }
0x158d   :  { %2006 = vst.msk [vmem:[#allocation2] sm:$0xff] %vm852_vm6, %v2001_v51 }
0x158e   :  { %v2981_v52 = vpop.eup %2980 }
0x158f   :  { %v2131_v13 = vmul.f32 %v2981_v52, %v2977_v18 }
0x1591   :  { %v2134_v53 = vpack.c.bf16 %v2131_v13, %v2131_v13 }
0x1592   :  { %v2983_v54 = vpop.eup %2982 }
0x1593   :  { %2848 = vmatmul.mubr.msk.bf16.vlgmr.msra.gmra.mxu0 %vm160_vm2, %v2134_v53  ;;  %v2133_v1 = vmul.f32 %v2983_v54, %v2979_v45 }
0x1594   :  { %2861 = vmatprep.mubr.msk.bf16.mxu0 %vm3079_vm1, %v3078_v8  ;;  %2858 = vmatpush3.bf16.msra.mxu0 %v2910_v58 }
0x1595   :  { %v2135_v55 = vpack.c.bf16 %v2133_v1, %v2133_v1  ;;  %2859 = vmatprep.subr.bf16.mxu0 %v3078_v8 }
0x1597   :  { %2854 = vmatmul.mubr.msk.bf16.vlgmr.msra.gmra.mxu1 %vm160_vm2, %v2135_v55 }
0x1598   :  { %2873 = vmatprep.mubr.msk.bf16.mxu1 %vm3079_vm1, %v3078_v8  ;;  %2860 = vmatpush3.bf16.msra.mxu0 %v2911_v59  ;;  %v2367_v59 = vsub.s32 1, %v3211_v19 }
0x1599   :  { %2866 = vmatpush3.bf16.msra.mxu1 %v2912_v3 }
0x159a   :  { %2867 = vmatprep.subr.bf16.mxu1 %v3078_v8  ;;  %v2368_v3 = vrot.slane %v3407_v47, %v2367_v59 }
0x159d   :  { %2868 = vmatpush3.bf16.msra.mxu1 %v2913_v16 }
0x159e   :  { %2869 = vmatprep.subr.bf16.mxu1 %v3078_v8 }
0x15a1   :  { %2870 = vmatpush3.bf16.msra.mxu1 %v2914_v27 }
0x15a2   :  { %2871 = vmatprep.subr.bf16.mxu1 %v3078_v8 }
0x15a5   :  { %2872 = vmatpush3.bf16.msra.mxu1 %v2915_v5 }
0x1653   :  { %v2178_v61 = vpop.f32.mrf.mxu0 }
0x1654   :  { %2234 = vrot.lane.b32.xlu0 %v2178_v61, %s3092_s1  ;;  %v2335_v61 = vsub.s32 5, %v3211_v19 }
0x1655   :  { %v2849_v0 = vpop.f32.mrf.mxu0 }
0x1657   :  { %v2181_v4 = vpop.f32.mrf.mxu0  ;;  %v2226_v15 = vpop.f32.mrf.mxu1 }
0x1658   :  { %2236 = vrot.lane.b32.xlu1 %v2226_v15, %s3092_s1  ;;  %2344 = vrot.lane.b32.xlu0 %v2342_v62, %s3080_s0  ;;  %v2330_v62 = vrot.slane %v3407_v47, %v2329_v14  ;;  %v2336_v15 = vrot.slane %v3407_v47, %v2335_v61  ;;  %s3044_s0 = scalar_lea.vmem %s2494_s26, 256 }
0x1659   :  { %v2850_v21 = vpop.f32.mrf.mxu0  ;;  %v2855_v23 = vpop.f32.mrf.mxu1  ;;  %p3045_p1 = scmp.ne.s32.totalorder %s2494_s26, %s3044_s0  ;;  %p3050_p3 = scmp.lt.s32.totalorder %s3044_s0, %s3044_s0 }
0x165b   :  { %v2229_v26 = vpop.f32.mrf.mxu1  ;;  %p3051_p4 = por %p3050_p3, %p3049_p2 }
0x165d   :  { %v2856_v28 = vpop.f32.mrf.mxu1  ;;  %p3052_p5 = pnand %p3051_p4, %p3045_p1 }
0x16c6   :  { %v2235_v29 = vpop.permute.xlu0 %2234 }
0x16c7   :  { %2240 = vst.msk [vmem:[#allocation2] sm:$0xff] %vm1087_vm7, %v2235_v29 }
0x16ca   :  { %v2237_v30 = vpop.permute.xlu1 %2236  ;;  %v2345_v31 = vpop.permute.xlu0 %2344 }
0x16cb   :  { %2241 = vst.msk [vmem:[#allocation2 + $0x8] sm:$0xff] %vm1087_vm7, %v2237_v30  ;;  %v2347_v22 = vadd.f32 %v2345_v31, %v3181_v9  ;;  %v2348_v33 = vadd.f32 %v2345_v31, %v3187_v11  ;;  %v2349_v6 = vadd.f32 %v2345_v31, %v3191_v12  ;;  %v2350_v34 = vadd.f32 %v2345_v31, %v3221_v24 }
0x16cd   :  { %v2351_v35 = vmax.f32 %v2347_v22, 0.0  ;;  %v2353_v36 = vmax.f32 %v2349_v6, 0.0  ;;  %v2352_v37 = vmax.f32 %v2348_v33, 0.0  ;;  %v2354_v8 = vmax.f32 %v2350_v34, 0.0 }
0x16ce   :  { %v2242_v10 = vld [vmem:[#allocation2] sm:$0xff] }
0x16cf   :  { %v2356_v20 = vpack.c.bf16 %v2354_v8, %v2352_v37  ;;  %v2355_v38 = vpack.c.bf16 %v2353_v36, %v2351_v35 }
0x16d1   :  { %2373 = vrot.lane.b32.xlu0 %v2356_v20, %s3093_s5  ;;  %2371 = vrot.lane.b32.xlu1 %v2355_v38, %s3093_s5 }
0x16d2   :  { %v2243_v25 = vld [vmem:[#allocation2 + $0x8] sm:$0xff] }
0x16d3   :  { %v2244_v63 = vpack.c.bf16 %v2243_v25, %v2242_v10 }
0x16d5   :  { %2862 = vmatmul.mubr.msk.bf16.vlgmr.msra.gmra.mxu0 %vm99_vm0, %v2244_v63 }
0x1743   :  { %v2374_v9 = vpop.permute.xlu0 %2373  ;;  %v2372_v11 = vpop.permute.xlu1 %2371 }
0x1744   :  { %v2376_v12 = vsel %vm99_vm0, %v2372_v11, %v2374_v9 }
0x1745   :  { %2874 = vmatmul.mubr.msk.bf16.vlgmr.msra.gmra.mxu1 %vm2401_vm10, %v2376_v12 }
0x1795   :  { %v2294_v24 = vpop.f32.mrf.mxu0 }
0x1796   :  { %v2295_v32 = vadd.f32 %v2294_v24, %v3412_v56 }
0x1797   :  { %v2863_v2 = vpop.f32.mrf.mxu0 }
0x1798   :  { %v2301_v39 = vsel %vm99_vm0, %v2295_v32, 0.0  ;;  %v2476_v2 = vsub.s32 6, %v3211_v19 }
0x1799   :  { %2302 = vadd.xlane.f32.xlu1 %v2301_v39  ;;  %v2297_v40 = vpop.f32.mrf.mxu0  ;;  %v2482_v39 = vsub.s32 7, %v3211_v19 }
0x179a   :  { %v2298_v41 = vadd.f32 %v2297_v40, %v3414_v57  ;;  %v2477_v40 = vrot.slane %v3407_v47, %v2476_v2 }
0x179b   :  { %v2864_v42 = vpop.f32.mrf.mxu0 }
0x179c   :  { %v2304_v60 = vsel %vm99_vm0, %v2298_v41, 0.0 }
0x179d   :  { %2305 = vadd.xlane.f32.xlu0 %v2304_v60  ;;  %v2483_v60 = vrot.slane %v3407_v47, %v2482_v39 }
0x1805   :  { %v2439_v7 = vpop.f32.mrf.mxu1 }
0x1806   :  { %v2440_v23 = vadd.f32 %v2439_v7, %v2368_v3 }
0x1807   :  { %v2875_v18 = vpop.f32.mrf.mxu1 }
0x1809   :  { %v2442_v43 = vpop.f32.mrf.mxu1 }
0x180a   :  { %v2443_v29 = vadd.f32 %v2442_v43, %v2368_v3 }
0x180b   :  { %v2876_v44 = vpop.f32.mrf.mxu1 }
0x1822   :  { %v2303_v45 = vpop.xlane.xlu1 %2302 }
0x1823   :  { %v2307_v46 = vmul.f32 0.03125, %v2303_v45 }
0x1825   :  { %v2309_v17 = vsub.f32 %v2295_v32, %v2307_v46 }
0x1826   :  { %v2306_v48 = vpop.xlane.xlu0 %2305 }
0x1827   :  { %v2308_v56 = vmul.f32 0.03125, %v2306_v48  ;;  %v2311_v49 = vmul.f32 %v2309_v17, %v2309_v17 }
0x1829   :  { %v2310_v50 = vsub.f32 %v2298_v41, %v2308_v56  ;;  %v2313_v51 = vsel %vm99_vm0, %v2311_v49, 0.0 }
0x182a   :  { %2314 = vadd.xlane.f32.xlu0 %v2313_v51 }
0x182b   :  { %v2312_v52 = vmul.f32 %v2310_v50, %v2310_v50 }
0x182d   :  { %v2316_v57 = vsel %vm99_vm0, %v2312_v52, 0.0 }
0x182e   :  { %2317 = vadd.xlane.f32.xlu1 %v2316_v57 }
0x18b3   :  { %v2315_v13 = vpop.xlane.xlu0 %2314 }
0x18b4   :  { %v2319_v53 = vmul.f32 0.03125, %v2315_v13 }
0x18b6   :  { %v2321_v54 = vadd.f32 1e-05, %v2319_v53 }
0x18b7   :  { %v2318_v1 = vpop.xlane.xlu1 %2317 }
0x18b8   :  { %2984 = vrsqrt.f32 %v2321_v54  ;;  %v2320_v55 = vmul.f32 0.03125, %v2318_v1 }
0x18ba   :  { %v2322_v58 = vadd.f32 1e-05, %v2320_v55 }
0x18bc   :  { %2986 = vrsqrt.f32 %v2322_v58 }
0x18c5   :  { %v2985_v0 = vpop.eup %2984 }
0x18c6   :  { %v2325_v4 = vmul.f32 %v2985_v0, %v2309_v17 }
0x18c8   :  { %v2331_v16 = vmul.f32 %v2330_v62, %v2325_v4 }
0x18c9   :  { %v2987_v21 = vpop.eup %2986 }
0x18ca   :  { %v2337_v26 = vadd.f32 %v2336_v15, %v2331_v16  ;;  %v2326_v27 = vmul.f32 %v2987_v21, %v2310_v50 }
0x18cc   :  { %v2446_v28 = vadd.f32 %v2440_v23, %v2337_v26  ;;  %v2332_v5 = vmul.f32 %v2330_v62, %v2326_v27 }
0x18ce   :  { %v2448_v30 = vsel %vm99_vm0, %v2446_v28, 0.0  ;;  %v2338_v31 = vadd.f32 %v2336_v15, %v2332_v5 }
0x18cf   :  { %2449 = vadd.xlane.f32.xlu0 %v2448_v30 }
0x18d0   :  { %v2447_v22 = vadd.f32 %v2443_v29, %v2338_v31 }
0x18d2   :  { %v2451_v33 = vsel %vm99_vm0, %v2447_v22, 0.0 }
0x18d3   :  { %2452 = vadd.xlane.f32.xlu1 %v2451_v33 }
0x1958   :  { %v2450_v6 = vpop.xlane.xlu0 %2449 }
0x1959   :  { %v2454_v34 = vmul.f32 0.03125, %v2450_v6 }
0x195b   :  { %v2456_v35 = vsub.f32 %v2446_v28, %v2454_v34 }
0x195c   :  { %v2453_v36 = vpop.xlane.xlu1 %2452 }
0x195d   :  { %v2455_v37 = vmul.f32 0.03125, %v2453_v36  ;;  %v2458_v8 = vmul.f32 %v2456_v35, %v2456_v35 }
0x195f   :  { %v2457_v20 = vsub.f32 %v2447_v22, %v2455_v37  ;;  %v2460_v38 = vsel %vm99_vm0, %v2458_v8, 0.0 }
0x1960   :  { %2461 = vadd.xlane.f32.xlu0 %v2460_v38 }
0x1961   :  { %v2459_v10 = vmul.f32 %v2457_v20, %v2457_v20 }
0x1963   :  { %v2463_v25 = vsel %vm99_vm0, %v2459_v10, 0.0 }
0x1964   :  { %2464 = vadd.xlane.f32.xlu1 %v2463_v25 }
0x19e9   :  { %v2462_v63 = vpop.xlane.xlu0 %2461 }
0x19ea   :  { %v2466_v9 = vmul.f32 0.03125, %v2462_v63 }
0x19ec   :  { %v2468_v11 = vadd.f32 1e-05, %v2466_v9 }
0x19ed   :  { %v2465_v12 = vpop.xlane.xlu1 %2464 }
0x19ee   :  { %2988 = vrsqrt.f32 %v2468_v11  ;;  %v2467_v24 = vmul.f32 0.03125, %v2465_v12 }
0x19f0   :  { %v2469_v32 = vadd.f32 1e-05, %v2467_v24 }
0x19f2   :  { %2990 = vrsqrt.f32 %v2469_v32 }
0x19fb   :  { %v2989_v41 = vpop.eup %2988 }
0x19fc   :  { %v2472_v42 = vmul.f32 %v2989_v41, %v2456_v35 }
0x19fe   :  { %v2478_v7 = vmul.f32 %v2477_v40, %v2472_v42 }
0x19ff   :  { %v2991_v18 = vpop.eup %2990 }
0x1a00   :  { %v2473_v43 = vmul.f32 %v2991_v18, %v2457_v20  ;;  %v2484_v44 = vadd.f32 %v2483_v60, %v2478_v7 }
0x1a02   :  { %v2479_v45 = vmul.f32 %v2477_v40, %v2473_v43  ;;  %2486 = vst.msk [vmem:[#allocation10] sm:$0xff] %vm99_vm0, %v2484_v44 }
0x1a04   :  { %v2485_v46 = vadd.f32 %v2483_v60, %v2479_v45 }
0x1a06   :  { %2487 = vst.msk [vmem:[#allocation10 + $0x8] sm:$0xff] %vm99_vm0, %v2485_v46 }
0x1a07   :  { %3055 = shalt.err (!%p3052_p5)
}
0x1a08   :  { %2499 = dma.vmem_to_hbm [thread:$0]  %s2494_s26, 256, %s3675_s7, [#allocation5], %s3073_s30, %s3073_s30, %s3074_s8  }
0x1a09   :  { %3070 = dma.done.wait [#allocation5], 256  }
0x1a0a   :  { %3071 = vsyncadd [#allocation5], 4294967040 }
0x1a0b   :  { %2503 = vsyncpa [#allocation4], 1 }
0x1a0c   :  { %2504 = vsyncpa [#allocation9], 1 }
0x1a0d   :  { %2505 = vsyncpa [#allocation5], 1 }
0x1a0e   :  { %2506 = vsyncpa [#allocation6], 1 }

</bundles_post_ra>
